<compile_context>
chip_gen: v7x
topology: tpu7x:2x2x1
jax: 0.10.0
libtpu: 0.0.40
codegen_flags: <defaults>
</compile_context>

<pallas_src>
import functools
import math

import jax
import jax.numpy as jnp
from jax.experimental import pallas as pl
from jax.experimental.pallas import tpu as pltpu


_VMEM_LIMIT = 48 * 1024 * 1024   # < v7x 64 MiB physical, > v5e 16 MiB default scoped
_ALIGN = 8                       # sublane-aligned offset for in-kernel padding


def _cparams(dims):
    return pltpu.CompilerParams(dimension_semantics=dims,
                                vmem_limit_bytes=_VMEM_LIMIT)


def _sigmoid(y):
    # tanh identity: a single EUP transcendental instead of exp + reciprocal.
    return 0.5 * (jnp.tanh(0.5 * y) + 1.0)


def _silu(y):
    return y * _sigmoid(y)


# ------------------- fused matmul + BN-affine + act --------------------------

def _matmul_bn_act_kernel(a_ref, b_ref, scale_ref, shift_ref, o_ref, *, act):
    acc = jnp.dot(a_ref[...], b_ref[...], preferred_element_type=jnp.float32)
    y = acc * scale_ref[...] + shift_ref[...]
    if act == "silu":
        y = _silu(y)
    o_ref[...] = y.astype(o_ref.dtype)


def matmul_bn_act(a, b, scale, shift, act="none", out_dtype=jnp.bfloat16,
                  tm=512, tn=512):
    """act((a @ b) * scale + shift). a:(M,K) bf16, b:(K,N) bf16, scale/shift:(1,N) f32."""
    M, K = a.shape
    K2, N = b.shape
    assert K == K2
    TM = min(tm, M)
    TN = min(tn, N)
    # N tiles on the outer grid axis so the weight column stripe stays resident
    # while the (inner, fast) M axis streams through it.
    return pl.pallas_call(
        functools.partial(_matmul_bn_act_kernel, act=act),
        out_shape=jax.ShapeDtypeStruct((M, N), out_dtype),
        grid=(pl.cdiv(N, TN), pl.cdiv(M, TM)),
        in_specs=[
            pl.BlockSpec((TM, K), lambda j, i: (i, 0)),
            pl.BlockSpec((K, TN), lambda j, i: (0, j)),
            pl.BlockSpec((1, TN), lambda j, i: (0, j)),
            pl.BlockSpec((1, TN), lambda j, i: (0, j)),
        ],
        out_specs=pl.BlockSpec((TM, TN), lambda j, i: (i, j)),
        compiler_params=_cparams(("parallel", "parallel")),
    )(a, b, scale, shift)


def conv1x1_bn_act(x, wmat, scale, shift, act):
    """1x1 conv as a matmul. x:(N,H,W,Cin) bf16, wmat:(Cin,Cout) bf16."""
    N, H, W, C = x.shape
    y = matmul_bn_act(x.reshape(N * H * W, C), wmat, scale, shift, act)
    return y.reshape(N, H, W, wmat.shape[1])


# ------- stride-1 depthwise conv + BN + SiLU + fused SE pool (no HBM pad) ----

def _dw_s1_kernel(x_ref, w_ref, scale_ref, shift_ref, o_ref, pool_ref,
                  xpad_ref, *, k, ho, wo):
    p = (k - 1) // 2
    # In-kernel zero padding: no padded copy of the activation in HBM.  x is
    # stored at an 8-aligned sublane offset; the surrounding scratch is zero.
    xpad_ref[...] = jnp.zeros_like(xpad_ref)
    xpad_ref[_ALIGN:_ALIGN + ho, _ALIGN:_ALIGN + wo, :] = x_ref[0]
    w = w_ref[...]                                        # (KK, C) f32
    acc = None
    for dy in range(k):
        for dx in range(k):
            r0 = _ALIGN - p + dy
            c0 = _ALIGN - p + dx
            tap = xpad_ref[r0:r0 + ho, c0:c0 + wo, :].astype(jnp.float32)
            ki = dy * k + dx
            t = tap * w[ki:ki + 1, :]
            acc = t if acc is None else acc + t
    y = acc * scale_ref[...] + shift_ref[...]
    y = _silu(y)
    c = y.shape[-1]
    o_ref[...] = y.reshape(1, ho, wo, c).astype(o_ref.dtype)
    # SE squeeze fused here: the expanded tensor is read once for conv+pool.
    pool_ref[...] = jnp.mean(y.reshape(ho * wo, c), axis=0,
                             keepdims=True).reshape(1, 1, c)


def depthwise_s1_silu_pool(x, w_kkc, scale, shift, k):
    """Stride-1 depthwise conv + BN + SiLU; also returns the spatial mean."""
    N, H, W, C = x.shape
    p = (k - 1) // 2
    y, pooled = pl.pallas_call(
        functools.partial(_dw_s1_kernel, k=k, ho=H, wo=W),
        out_shape=(jax.ShapeDtypeStruct((N, H, W, C), x.dtype),
                   jax.ShapeDtypeStruct((N, 1, C), jnp.float32)),
        grid=(N,),
        in_specs=[
            pl.BlockSpec((1, H, W, C), lambda n: (n, 0, 0, 0)),
            pl.BlockSpec((k * k, C), lambda n: (0, 0)),
            pl.BlockSpec((1, C), lambda n: (0, 0)),
            pl.BlockSpec((1, C), lambda n: (0, 0)),
        ],
        out_specs=[
            pl.BlockSpec((1, H, W, C), lambda n: (n, 0, 0, 0)),
            pl.BlockSpec((1, 1, C), lambda n: (n, 0, 0)),
        ],
        scratch_shapes=[pltpu.VMEM((H + _ALIGN + p, W + _ALIGN + p, C),
                                   x.dtype)],
        compiler_params=_cparams(("parallel",)),
    )(x, w_kkc, scale, shift)
    return y, pooled.reshape(N, C)


# ------- stride-2 depthwise conv + BN + SiLU + fused SE pool (no im2col) -----

def _dw_s2_kernel(x00_ref, x01_ref, x10_ref, x11_ref, w_ref, scale_ref,
                  shift_ref, o_ref, pool_ref, *, k, ho, wo):
    planes = (x00_ref, x01_ref, x10_ref, x11_ref)         # [(dy%2)*2 + dx%2]
    w = w_ref[...]                                        # (KK, C) f32
    acc = None
    for dy in range(k):
        for dx in range(k):
            src = planes[(dy % 2) * 2 + (dx % 2)]
            qy, qx = dy // 2, dx // 2
            tap = src[0, qy:qy + ho, qx:qx + wo, :].astype(jnp.float32)
            ki = dy * k + dx
            t = tap * w[ki:ki + 1, :]
            acc = t if acc is None else acc + t
    y = acc * scale_ref[...] + shift_ref[...]
    y = _silu(y)
    c = y.shape[-1]
    o_ref[...] = y.reshape(1, ho, wo, c).astype(o_ref.dtype)
    pool_ref[...] = jnp.mean(y.reshape(ho * wo, c), axis=0,
                             keepdims=True).reshape(1, 1, c)


def depthwise_s2_silu_pool(x, w_kkc, scale, shift, k):
    """Stride-2 depthwise conv + BN + SiLU + fused SE squeeze.

    The (zero-padded) input is split once into its four (row, col) parities in
    XLA — a single activation-sized copy — so every tap in the kernel is a
    plain static, unstrided, lane-aligned slice.  No KK-fold im2col tensor
    ever touches HBM.
    """
    N, H, W, C = x.shape
    p = (k - 1) // 2
    Ho = (H + 2 * p - k) // 2 + 1
    Wo = (W + 2 * p - k) // 2 + 1
    Hs, Ws = Ho + p, Wo + p
    xp = jnp.pad(x, ((0, 0), (p, 2 * Hs - H - p), (p, 2 * Ws - W - p), (0, 0)))
    parts = [xp[:, py::2, px::2, :] for py in range(2) for px in range(2)]
    plane_spec = pl.BlockSpec((1, Hs, Ws, C), lambda n: (n, 0, 0, 0))
    y, pooled = pl.pallas_call(
        functools.partial(_dw_s2_kernel, k=k, ho=Ho, wo=Wo),
        out_shape=(jax.ShapeDtypeStruct((N, Ho, Wo, C), x.dtype),
                   jax.ShapeDtypeStruct((N, 1, C), jnp.float32)),
        grid=(N,),
        in_specs=[plane_spec, plane_spec, plane_spec, plane_spec,
                  pl.BlockSpec((k * k, C), lambda n: (0, 0)),
                  pl.BlockSpec((1, C), lambda n: (0, 0)),
                  pl.BlockSpec((1, C), lambda n: (0, 0))],
        out_specs=[
            pl.BlockSpec((1, Ho, Wo, C), lambda n: (n, 0, 0, 0)),
            pl.BlockSpec((1, 1, C), lambda n: (n, 0, 0)),
        ],
        compiler_params=_cparams(("parallel",)),
    )(*parts, w_kkc, scale, shift)
    return y, pooled.reshape(N, C)


# ----------------------------- SE gate MLP -----------------------------------

def _se_gate_kernel(p_ref, w1_ref, b1_ref, w2_ref, b2_ref, o_ref):
    h = jnp.dot(p_ref[...].astype(jnp.bfloat16), w1_ref[...],
                preferred_element_type=jnp.float32) + b1_ref[...]
    h = _silu(h)
    s = jnp.dot(h.astype(jnp.bfloat16), w2_ref[...],
                preferred_element_type=jnp.float32) + b2_ref[...]
    o_ref[...] = _sigmoid(s)


def se_gate(pooled, w1, b1, w2, b2):
    """pooled:(N,Cexp) f32 -> gate s:(N,Cexp) f32 (tiny; whole-array kernel)."""
    return pl.pallas_call(
        _se_gate_kernel,
        out_shape=jax.ShapeDtypeStruct(pooled.shape, jnp.float32),
    )(pooled, w1, b1, w2, b2)


# ---------- projection 1x1 conv with fused SE gating (+ residual) ------------

def _gated_proj_kernel(*refs, has_res):
    if has_res:
        a_ref, g_ref, b_ref, scale_ref, shift_ref, r_ref, o_ref = refs
    else:
        a_ref, g_ref, b_ref, scale_ref, shift_ref, o_ref = refs
        r_ref = None
    # SE gating in bf16 (gate in (0,1)): no (TM, C) f32 temporary.
    a = a_ref[0] * g_ref[0].astype(jnp.bfloat16)
    acc = jnp.dot(a, b_ref[...], preferred_element_type=jnp.float32)
    y = acc * scale_ref[...] + shift_ref[...]
    if has_res:
        y = y + r_ref[0].astype(jnp.float32)
    o_ref[...] = y.reshape(o_ref.shape).astype(o_ref.dtype)


def conv1x1_gated_proj(x, gate, wmat, scale, shift, residual=None, tm_cap=512):
    N, H, W, C = x.shape
    HW = H * W
    Cout = wmat.shape[1]
    x3 = x.reshape(N, HW, C)
    g3 = gate.reshape(N, 1, C)
    TM = min(tm_cap, HW)
    in_specs = [
        pl.BlockSpec((1, TM, C), lambda n, t: (n, t, 0)),
        pl.BlockSpec((1, 1, C), lambda n, t: (n, 0, 0)),
        pl.BlockSpec((C, Cout), lambda n, t: (0, 0)),
        pl.BlockSpec((1, Cout), lambda n, t: (0, 0)),
        pl.BlockSpec((1, Cout), lambda n, t: (0, 0)),
    ]
    args = [x3, g3, wmat, scale, shift]
    has_res = residual is not None
    if has_res:
        in_specs.append(pl.BlockSpec((1, TM, Cout), lambda n, t: (n, t, 0)))
        args.append(residual.reshape(N, HW, Cout))
    out = pl.pallas_call(
        functools.partial(_gated_proj_kernel, has_res=has_res),
        out_shape=jax.ShapeDtypeStruct((N, HW, Cout), x.dtype),
        grid=(N, pl.cdiv(HW, TM)),
        in_specs=in_specs,
        out_specs=pl.BlockSpec((1, TM, Cout), lambda n, t: (n, t, 0)),
        compiler_params=_cparams(("parallel", "parallel")),
    )(*args)
    return out.reshape(N, H, W, Cout)


# --------------- head 1x1 conv + BN + SiLU fused with global pool ------------

def _head_pool_kernel(a_ref, b_ref, scale_ref, shift_ref, o_ref,
                      *, hw, inv_hw, tm):
    t = pl.program_id(1)

    @pl.when(t == 0)
    def _():
        o_ref[...] = jnp.zeros_like(o_ref)

    acc = jnp.dot(a_ref[0], b_ref[...], preferred_element_type=jnp.float32)
    y = acc * scale_ref[...] + shift_ref[...]
    y = _silu(y)
    rows = t * tm + jax.lax.broadcasted_iota(jnp.int32, (tm, 1), 0)
    y = jnp.where(rows < hw, y, 0.0)                    # mask ragged rows
    o_ref[...] += (jnp.sum(y, axis=0, keepdims=True) * inv_hw).reshape(o_ref.shape)


def head_conv_global_pool(x, wmat, scale, shift, tm_cap=512):
    """Head conv + BN + SiLU + global avg pool; head activation stays on-chip."""
    N, H, W, C = x.shape
    HW = H * W
    Cout = wmat.shape[1]
    x3 = x.reshape(N, HW, C)
    TM = min(tm_cap, HW)
    out = pl.pallas_call(
        functools.partial(_head_pool_kernel, hw=HW, inv_hw=1.0 / HW, tm=TM),
        out_shape=jax.ShapeDtypeStruct((N, 1, Cout), jnp.float32),
        grid=(N, pl.cdiv(HW, TM)),
        in_specs=[
            pl.BlockSpec((1, TM, C), lambda n, t: (n, t, 0)),
            pl.BlockSpec((C, Cout), lambda n, t: (0, 0)),
            pl.BlockSpec((1, Cout), lambda n, t: (0, 0)),
            pl.BlockSpec((1, Cout), lambda n, t: (0, 0)),
        ],
        out_specs=pl.BlockSpec((1, 1, Cout), lambda n, t: (n, 0, 0)),
        compiler_params=_cparams(("parallel", "arbitrary")),
    )(x3, wmat, scale, shift)
    return out.reshape(N, Cout)


# ------------------------------ stem conv ------------------------------------

def stem_conv_bn_silu(x, wmat, scale, shift, k=3, stride=2):
    """Stem kxk conv via im2col (tiny: Cin=3, K=27) + fused BN + SiLU."""
    N, H, W, C = x.shape
    p = (k - 1) // 2
    xp = jnp.pad(x, ((0, 0), (p, p), (p, p), (0, 0)))
    Ho = (H + 2 * p - k) // stride + 1
    Wo = (W + 2 * p - k) // stride + 1
    cols = []
    for dy in range(k):
        for dx in range(k):
            cols.append(xp[:, dy:dy + stride * (Ho - 1) + 1:stride,
                              dx:dx + stride * (Wo - 1) + 1:stride, :])
    patches = jnp.concatenate(cols, axis=-1).reshape(N * Ho * Wo, k * k * C)
    y = matmul_bn_act(patches, wmat, scale, shift, act="silu")
    return y.reshape(N, Ho, Wo, wmat.shape[1])


# --------------------------- parameters (raw) ---------------------------------

class ParamGen:
    def __init__(self, seed=0):
        self.key = jax.random.PRNGKey(seed)

    def _next(self):
        self.key, sub = jax.random.split(self.key)
        return sub

    def conv(self, cin, cout, k):
        fan_in = cin * k * k
        return jax.random.normal(self._next(), (cout, cin, k, k),
                                 jnp.float32) * math.sqrt(2.0 / fan_in)

    def dwconv(self, c, k):
        return jax.random.normal(self._next(), (c, 1, k, k),
                                 jnp.float32) * math.sqrt(2.0 / (k * k))

    def bn(self, c):
        eps = 1e-5  # torchvision BatchNorm2d default
        gamma = 1.0 + 0.01 * jax.random.normal(self._next(), (c,), jnp.float32)
        beta = 0.01 * jax.random.normal(self._next(), (c,), jnp.float32)
        mean = 0.01 * jax.random.normal(self._next(), (c,), jnp.float32)
        var = jnp.ones((c,), jnp.float32)
        scale = gamma / jnp.sqrt(var + eps)
        shift = beta - mean * scale
        return scale, shift

    def bias(self, c):
        return 0.01 * jax.random.normal(self._next(), (c,), jnp.float32)

    def linear(self, cin, cout):
        w = jax.random.normal(self._next(), (cout, cin),
                              jnp.float32) * math.sqrt(1.0 / cin)
        return w, self.bias(cout)


def b3_stage_config():
    # (expand_ratio, kernel, stride, in_ch, out_ch, num_layers) after B3 scaling
    return [
        (1, 3, 1, 40, 24, 2),
        (6, 3, 2, 24, 32, 3),
        (6, 5, 2, 32, 48, 3),
        (6, 3, 2, 48, 96, 5),
        (6, 5, 1, 96, 136, 5),
        (6, 5, 2, 136, 232, 6),
        (6, 3, 1, 232, 384, 2),
    ]


def init_params(seed=0):
    pg = ParamGen(seed)
    params = {"stem": {"w": pg.conv(3, 40, 3), "bn": pg.bn(40)}}
    stages = []
    for (exp, k, s, cin, cout, n) in b3_stage_config():
        blocks = []
        for i in range(n):
            ic = cin if i == 0 else cout
            stride = s if i == 0 else 1
            expanded = ic * exp
            sq = max(1, ic // 4)
            blk = {"stride": stride, "in": ic, "out": cout, "k": k}
            if expanded != ic:
                blk["expand_w"] = pg.conv(ic, expanded, 1)
                blk["expand_bn"] = pg.bn(expanded)
            blk["dw_w"] = pg.dwconv(expanded, k)
            blk["dw_bn"] = pg.bn(expanded)
            blk["se_w1"] = pg.conv(expanded, sq, 1)
            blk["se_b1"] = pg.bias(sq)
            blk["se_w2"] = pg.conv(sq, expanded, 1)
            blk["se_b2"] = pg.bias(expanded)
            blk["proj_w"] = pg.conv(expanded, cout, 1)
            blk["proj_bn"] = pg.bn(cout)
            blocks.append(blk)
        stages.append(blocks)
    params["stages"] = stages
    params["head"] = {"w": pg.conv(384, 1536, 1), "bn": pg.bn(1536)}
    params["fc_w"], params["fc_b"] = pg.linear(1536, 2)
    return params


# ---------------- parameter prep (pre-transpose, native channels) ------------

def _vec(v):
    return v.reshape(1, -1).astype(jnp.float32)


def _prep_conv1x1(w):
    cout, cin = w.shape[0], w.shape[1]
    return jnp.transpose(w.reshape(cout, cin), (1, 0)).astype(jnp.bfloat16)


def _prep_dw(w):
    c, _, kh, kw = w.shape
    return jnp.transpose(w.reshape(c, kh * kw), (1, 0)).astype(jnp.float32)


def prepare_params(raw):
    """Pre-transpose weights into kernel-friendly layouts (done once).
    Channel counts are kept native; kernels accept full-dim (non-128) lanes."""
    prep = {}
    w = raw["stem"]["w"]                                      # (40, 3, 3, 3)
    cout = w.shape[0]
    b = jnp.transpose(w, (2, 3, 1, 0)).reshape(-1, cout).astype(jnp.bfloat16)
    sc, sh = raw["stem"]["bn"]
    prep["stem"] = {"w": b, "scale": _vec(sc), "shift": _vec(sh)}

    stages = []
    for blocks in raw["stages"]:
        pblocks = []
        for blk in blocks:
            ic, oc, k, stride = blk["in"], blk["out"], blk["k"], blk["stride"]
            pb = {"k": k, "stride": stride,
                  "use_res": (stride == 1 and ic == oc)}
            if "expand_w" in blk:
                sc, sh = blk["expand_bn"]
                pb["expand"] = {"w": _prep_conv1x1(blk["expand_w"]),
                                "scale": _vec(sc), "shift": _vec(sh)}
            else:
                pb["expand"] = None
            sc, sh = blk["dw_bn"]
            pb["dw_w"] = _prep_dw(blk["dw_w"])
            pb["dw_scale"] = _vec(sc)
            pb["dw_shift"] = _vec(sh)
            pb["se_w1"] = _prep_conv1x1(blk["se_w1"])
            pb["se_b1"] = _vec(blk["se_b1"])
            pb["se_w2"] = _prep_conv1x1(blk["se_w2"])
            pb["se_b2"] = _vec(blk["se_b2"])
            sc, sh = blk["proj_bn"]
            pb["proj_w"] = _prep_conv1x1(blk["proj_w"])
            pb["proj_scale"] = _vec(sc)
            pb["proj_shift"] = _vec(sh)
            pblocks.append(pb)
        stages.append(pblocks)
    prep["stages"] = stages

    sc, sh = raw["head"]["bn"]
    prep["head"] = {"w": _prep_conv1x1(raw["head"]["w"]),
                    "scale": _vec(sc), "shift": _vec(sh)}

    fc_w, fc_b = raw["fc_w"], raw["fc_b"]                     # (2, 1536), (2,)
    prep["fc_w"] = jnp.transpose(fc_w, (1, 0)).astype(jnp.bfloat16)
    prep["fc_scale"] = jnp.ones((1, fc_w.shape[0]), jnp.float32)
    prep["fc_shift"] = _vec(fc_b)
    return prep


# ------------------------------ forward --------------------------------------

def mbconv(x, pb):
    inp = x
    h = x
    if pb["expand"] is not None:
        e = pb["expand"]
        h = conv1x1_bn_act(h, e["w"], e["scale"], e["shift"], act="silu")
    if pb["stride"] == 1:
        h, pooled = depthwise_s1_silu_pool(h, pb["dw_w"], pb["dw_scale"],
                                           pb["dw_shift"], pb["k"])
    else:
        h, pooled = depthwise_s2_silu_pool(h, pb["dw_w"], pb["dw_scale"],
                                           pb["dw_shift"], pb["k"])
    gate = se_gate(pooled, pb["se_w1"], pb["se_b1"], pb["se_w2"], pb["se_b2"])
    res = inp if pb["use_res"] else None   # stochastic depth = identity at eval
    return conv1x1_gated_proj(h, gate, pb["proj_w"], pb["proj_scale"],
                              pb["proj_shift"], residual=res)


def efficientnet_b3_gradcam_forward(prep, x_nchw):
    # NCHW (PyTorch) -> NHWC bf16 for the TPU kernels
    x = jnp.transpose(x_nchw, (0, 2, 3, 1)).astype(jnp.bfloat16)
    x = stem_conv_bn_silu(x, prep["stem"]["w"], prep["stem"]["scale"],
                          prep["stem"]["shift"], k=3, stride=2)
    for blocks in prep["stages"]:
        for pb in blocks:
            x = mbconv(x, pb)
    # head conv 384->1536 fused with global avg pool + squeeze -> (N, 1536)
    feat = head_conv_global_pool(x, prep["head"]["w"], prep["head"]["scale"],
                                 prep["head"]["shift"])
    # classifier: Dropout(0.3) (identity at inference) + Linear(1536, 2)
    logits = matmul_bn_act(feat.astype(jnp.bfloat16), prep["fc_w"],
                           prep["fc_scale"], prep["fc_shift"],
                           act="none", out_dtype=jnp.float32)
    return logits


# ------------------------------- main ----------------------------------------

if __name__ == "__main__":
    raw = init_params(seed=0)
    prep = prepare_params(raw)
    key = jax.random.PRNGKey(0)
    # small NCHW input (batch=2, 3 channels, 64x64 spatial)
    x = jax.random.normal(key, (2, 3, 64, 64), jnp.float32)
    out = efficientnet_b3_gradcam_forward(prep, x)
    out = jax.block_until_ready(out)
    assert out.shape == (2, 2) and out.dtype == jnp.float32
    print("KERNEL_OK")
</pallas_src>

<mosaic_0001>
module attributes {stable_mosaic.version = 11 : i64} {
  func.func @_matmul_bn_act_kernel(%arg0: i32, %arg1: i32, %arg2: memref<512x27xbf16, #tpu.memory_space<vmem>>, %arg3: memref<27x40xbf16, #tpu.memory_space<vmem>>, %arg4: memref<1x40xf32, #tpu.memory_space<vmem>>, %arg5: memref<1x40xf32, #tpu.memory_space<vmem>>, %arg6: memref<512x40xbf16, #tpu.memory_space<vmem>>) attributes {dimension_semantics = [#tpu.dimension_semantics<parallel>, #tpu.dimension_semantics<parallel>], iteration_bounds = array<i64: 1, 4>, scalar_prefetch = 0 : i64, scratch_operands = 0 : i64, tpu.core_type = #tpu.core_type<tc>, window_params = [{transform_indices = @transform_0, window_bounds = array<i64: 512, 27>}, {transform_indices = @transform_1, window_bounds = array<i64: 27, 40>}, {transform_indices = @transform_2, window_bounds = array<i64: 1, 40>}, {transform_indices = @transform_3, window_bounds = array<i64: 1, 40>}, {transform_indices = @transform_4, window_bounds = array<i64: 512, 40>}]} {
    %c0 = arith.constant 0 : index
    %c0_0 = arith.constant 0 : index
    %0 = vector.load %arg2[%c0, %c0_0] : memref<512x27xbf16, #tpu.memory_space<vmem>>, vector<512x27xbf16>
    %c0_1 = arith.constant 0 : index
    %c0_2 = arith.constant 0 : index
    %1 = vector.load %arg3[%c0_1, %c0_2] : memref<27x40xbf16, #tpu.memory_space<vmem>>, vector<27x40xbf16>
    %cst = arith.constant dense<0.000000e+00> : vector<512x40xf32>
    %2 = tpu.matmul %0, %1, %cst {dimension_numbers = #tpu.dot_dimension_numbers<[1], [0], [0], [1], [0, 0, 1, 1], [], []>} : vector<512x27xbf16>, vector<27x40xbf16>, vector<512x40xf32> -> vector<512x40xf32>
    %c0_3 = arith.constant 0 : index
    %c0_4 = arith.constant 0 : index
    %3 = vector.load %arg4[%c0_3, %c0_4] : memref<1x40xf32, #tpu.memory_space<vmem>>, vector<1x40xf32>
    %4 = vector.broadcast %3 : vector<1x40xf32> to vector<512x40xf32>
    %5 = arith.mulf %2, %4 : vector<512x40xf32>
    %c0_5 = arith.constant 0 : index
    %c0_6 = arith.constant 0 : index
    %6 = vector.load %arg5[%c0_5, %c0_6] : memref<1x40xf32, #tpu.memory_space<vmem>>, vector<1x40xf32>
    %7 = vector.broadcast %6 : vector<1x40xf32> to vector<512x40xf32>
    %8 = arith.addf %5, %7 : vector<512x40xf32>
    %cst_7 = arith.constant 5.000000e-01 : f32
    %9 = vector.broadcast %cst_7 : f32 to vector<512x40xf32>
    %10 = arith.mulf %9, %8 : vector<512x40xf32>
    %11 = math.tanh %10 : vector<512x40xf32>
    %cst_8 = arith.constant 1.000000e+00 : f32
    %12 = vector.broadcast %cst_8 : f32 to vector<512x40xf32>
    %13 = arith.addf %11, %12 : vector<512x40xf32>
    %cst_9 = arith.constant 5.000000e-01 : f32
    %14 = vector.broadcast %cst_9 : f32 to vector<512x40xf32>
    %15 = arith.mulf %14, %13 : vector<512x40xf32>
    %16 = arith.mulf %8, %15 : vector<512x40xf32>
    %17 = arith.truncf %16 : vector<512x40xf32> to vector<512x40xbf16>
    %c0_10 = arith.constant 0 : index
    %c0_11 = arith.constant 0 : index
    %18 = vector.load %arg6[%c0_10, %c0_11] : memref<512x40xbf16, #tpu.memory_space<vmem>>, vector<512x40xbf16>
    tpu.vector_store %arg6[%c0_10, %c0_11], %17 {strides = array<i32>} : memref<512x40xbf16, #tpu.memory_space<vmem>>, vector<512x40xbf16>,
    return
  }
  func.func @transform_0(%arg0: i32, %arg1: i32) -> (i32, i32) {
    %c0_i32 = arith.constant 0 : i32
    %c0_i32_0 = arith.constant 0 : i32
    return %arg1, %c0_i32 : i32, i32
  }
  func.func @transform_1(%arg0: i32, %arg1: i32) -> (i32, i32) {
    %c0_i32 = arith.constant 0 : i32
    %c0_i32_0 = arith.constant 0 : i32
    return %c0_i32, %arg0 : i32, i32
  }
  func.func @transform_2(%arg0: i32, %arg1: i32) -> (i32, i32) {
    %c0_i32 = arith.constant 0 : i32
    %c0_i32_0 = arith.constant 0 : i32
    return %c0_i32, %arg0 : i32, i32
  }
  func.func @transform_3(%arg0: i32, %arg1: i32) -> (i32, i32) {
    %c0_i32 = arith.constant 0 : i32
    %c0_i32_0 = arith.constant 0 : i32
    return %c0_i32, %arg0 : i32, i32
  }
  func.func @transform_4(%arg0: i32, %arg1: i32) -> (i32, i32) {
    %c0_i32 = arith.constant 0 : i32
    return %arg1, %arg0 : i32, i32
  }
}

</mosaic_0001>

<bundles_post_ra>
// kernel: tpu_custom_call.1
= control target key start
LH: loop header
LB: loop body
LE: loop exit
PB: predicated region body
PF: predicated region fallthrough
CT: control target
= control target key end

     0   :  { %s2351_s15 = smov 0   ;;  %s2353_s16 = smov 0   ;;  %s3130_s0 = inlined_call_operand.vmem [shape: bf16[2048,27], index: 0, kind: input, shape index: {}]   ;;  %s3131_s1 = inlined_call_operand.vmem [shape: bf16[27,40], index: 1, kind: input, shape index: {}]   ;;  %s3132_s2 = inlined_call_operand.vmem [shape: f32[1,40], index: 2, kind: input, shape index: {}]   ;;  %s3133_s3 = inlined_call_operand.vmem [shape: f32[1,40], index: 3, kind: input, shape index: {}]   ;;  %s3134_s4 = inlined_call_operand.vmem [shape: bf16[2048,40], index: 4, kind: output, shape index: {}]  }
   0x1   :  { %s2355_s17 = smov 0  }
   0x2 LB: > { %s23_s18 = sadd.s32 1, %s2319_s16  ;;  %p1803_p0 = scmp.ge.s32.totalorder %s2323_s17, 1  ;;  %s2323_s17 = sphi %s2355_s17, %s14_s17   ;;  %s2319_s16 = sphi %s2353_s16, %s3138_s16   ;;  %s2315_s15 = sphi %s2351_s15, %s3137_s15  }
   0x3   : > { %p24_p1 = scmp.ge.s32.totalorder %s23_s18, 4  ;;  %p202_p2 = scmp.lt.s32.totalorder %s2323_s17, 5 }
   0x5   : > { %s3140_s18 = smov (%p24_p1, %s23_s18), 0  ;;  %p203_p3 = pnand %p1803_p0, %p202_p2 }
   0x7   : > { %206 = sbr.rel (%p203_p3) target bundleno = 379 (0x17b), region = 36 }
   0xe   : > { %v2137_v0 = vld [vmem:[%s3131_s1] sm:$0xff]   ;;  %vm603_vm0 = vcmask 1044480   ;;  %v2138_v1 = vld [vmem:[%s3131_s1 + $0x8] sm:$0x3f]   ;;  %vm604_vm1 = vcmask 1045504   ;;  %s1804_s23 = sshll.u32 %s2315_s15, 6 }
   0xf   : > { %2040 = vmatprep.subr.bf16.mxu0 %v2137_v0  ;;  %2108 = vmatprep.subr.bf16.mxu1 %v2137_v0  ;;  %v2325_v2 = vmov 65535   ;;  %p242_p4 = scmp.lt.s32.totalorder %s1804_s23, 255  ;;  %vm506_vm2 = vcmask 220160   ;;  %v2452_v38 = vld [vmem:[%s3132_s2] ss:$0 sm:$0xff]  ;;  %vm1617_vm3 = vcmask 322560  }
  0x10   : > { %2041 = vmatpush3.bf16.msra.mxu0 %v2137_v0  ;;  %2110 = vmatpush3.bf16.msra.mxu1 %v2137_v0  ;;  %v605_v3 = vsel %vm603_vm0, 4294967295, %v2325_v2  ;;  %v2457_v40 = vld [vmem:[%s3133_s3] ss:$0 sm:$0xff] }
  0x11   : > { %v606_v4 = vsel %vm604_vm1, %v605_v3, 0  ;;  %s3142_s23 = smov (!%p242_p4, %s1804_s23), 255 }
  0x12   : > { %v608_v5 = vand.u32 %v2138_v1, %v606_v4  ;;  %s1805_s24 = sshll.u32 %s3142_s23, 2 }
  0x13   : > { %s2383_s27 = scalar_lea.vmem %s3130_s0, %s1805_s24  ;;  %s2565_s8 = scalar_lea.vmem %s3134_s4, %s1805_s24 }
  0x14   : > { %2042 = vmatprep.subr.bf16.mxu0 %v608_v5  ;;  %2109 = vmatprep.subr.bf16.mxu1 %v608_v5  ;;  %v2139_v6 = vld [vmem:[%s2383_s27] sm:$0xff]   ;;  %v2141_v8 = vld [vmem:[%s2383_s27 + $0x8] sm:$0xff]   ;;  %v2143_v10 = vld [vmem:[%s2383_s27 + $0x10] sm:$0xff]  }
  0x15   : > { %2043 = vmatpush3.bf16.msra.mxu0 %v608_v5  ;;  %2111 = vmatpush3.bf16.msra.mxu1 %v608_v5  ;;  %v2140_v7 = vld [vmem:[%s2383_s27 + $0x80] sm:$0xff]   ;;  %v2142_v9 = vld [vmem:[%s2383_s27 + $0x88] sm:$0xff]   ;;  %v2144_v11 = vld [vmem:[%s2383_s27 + $0x90] sm:$0xff]  }
  0x16   : > { %2044 = vmatprep.mubr.msk.bf16.mxu0 %vm506_vm2, %v2139_v6  ;;  %2076 = vmatprep.mubr.msk.bf16.mxu1 %vm506_vm2, %v2140_v7  ;;  %v2145_v12 = vld [vmem:[%s2383_s27 + $0x18] sm:$0xff]   ;;  %v2147_v14 = vld [vmem:[%s2383_s27 + $0x20] sm:$0xff]   ;;  %v2149_v16 = vld [vmem:[%s2383_s27 + $0x28] sm:$0xff]  }
  0x17   : > { %v2146_v13 = vld [vmem:[%s2383_s27 + $0x98] sm:$0xff]   ;;  %v2148_v15 = vld [vmem:[%s2383_s27 + $0xa0] sm:$0xff]   ;;  %v2150_v17 = vld [vmem:[%s2383_s27 + $0xa8] sm:$0xff]  }
  0x18   : > { %2045 = vmatmul.mubr.msk.bf16.vlgmr.msra.gmra.mrb[0].mxu0 %vm506_vm2, %v2141_v8  ;;  %2077 = vmatmul.mubr.msk.bf16.vlgmr.msra.gmra.mrb[0].mxu1 %vm506_vm2, %v2142_v9  ;;  %v2151_v18 = vld [vmem:[%s2383_s27 + $0x30] sm:$0xff]   ;;  %v2153_v20 = vld [vmem:[%s2383_s27 + $0x38] sm:$0xff]   ;;  %v2155_v22 = vld [vmem:[%s2383_s27 + $0x40] sm:$0xff]  }
  0x19   : > { %2048 = vmatprep.mubr.msk.bf16.mxu0 %vm506_vm2, %v2143_v10  ;;  %2080 = vmatprep.mubr.msk.bf16.mxu1 %vm506_vm2, %v2144_v11  ;;  %v2152_v19 = vld [vmem:[%s2383_s27 + $0xb0] sm:$0xff]   ;;  %v2154_v21 = vld [vmem:[%s2383_s27 + $0xb8] sm:$0xff]   ;;  %v2156_v23 = vld [vmem:[%s2383_s27 + $0xc0] sm:$0xff]  }
  0x1a   : > { %v2157_v24 = vld [vmem:[%s2383_s27 + $0x48] sm:$0xff]   ;;  %v2159_v26 = vld [vmem:[%s2383_s27 + $0x50] sm:$0xff]   ;;  %v2161_v28 = vld [vmem:[%s2383_s27 + $0x58] sm:$0xff]  }
  0x1b   : > { %v2158_v25 = vld [vmem:[%s2383_s27 + $0xc8] sm:$0xff]   ;;  %v2160_v27 = vld [vmem:[%s2383_s27 + $0xd0] sm:$0xff]   ;;  %v2162_v29 = vld [vmem:[%s2383_s27 + $0xd8] sm:$0xff]  }
  0x1c   : > { %v2163_v30 = vld [vmem:[%s2383_s27 + $0x60] sm:$0xff]   ;;  %v2165_v32 = vld [vmem:[%s2383_s27 + $0x68] sm:$0xff]   ;;  %v2167_v34 = vld [vmem:[%s2383_s27 + $0x70] sm:$0xff]  }
  0x1d   : > { %v2164_v31 = vld [vmem:[%s2383_s27 + $0xe0] sm:$0xff]   ;;  %v2166_v33 = vld [vmem:[%s2383_s27 + $0xe8] sm:$0xff]   ;;  %v2168_v35 = vld [vmem:[%s2383_s27 + $0xf0] sm:$0xff]  }
  0x1e   : > { %v2169_v36 = vld [vmem:[%s2383_s27 + $0x78] sm:$0xff]  }
  0x1f   : > { %v2170_v37 = vld [vmem:[%s2383_s27 + $0xf8] sm:$0xff]  }
  0x20   : > { %2049 = vmatmul.mubr.msk.bf16.gmra.mrb[4].mxu0 %vm506_vm2, %v2145_v12  ;;  %2081 = vmatmul.mubr.msk.bf16.gmra.mrb[4].mxu1 %vm506_vm2, %v2146_v13 }
  0x21   : > { %2052 = vmatprep.mubr.msk.bf16.mxu0 %vm506_vm2, %v2147_v14  ;;  %2084 = vmatprep.mubr.msk.bf16.mxu1 %vm506_vm2, %v2148_v15 }
  0x28   : > { %2053 = vmatmul.mubr.msk.bf16.gmra.mrb[8].mxu0 %vm506_vm2, %v2149_v16  ;;  %2085 = vmatmul.mubr.msk.bf16.gmra.mrb[8].mxu1 %vm506_vm2, %v2150_v17 }
  0x29   : > { %2056 = vmatprep.mubr.msk.bf16.mxu0 %vm506_vm2, %v2151_v18  ;;  %2088 = vmatprep.mubr.msk.bf16.mxu1 %vm506_vm2, %v2152_v19 }
  0x30   : > { %2057 = vmatmul.mubr.msk.bf16.gmra.mrb[12].mxu0 %vm506_vm2, %v2153_v20  ;;  %2089 = vmatmul.mubr.msk.bf16.gmra.mrb[12].mxu1 %vm506_vm2, %v2154_v21 }
  0x31   : > { %2060 = vmatprep.mubr.msk.bf16.mxu0 %vm506_vm2, %v2155_v22  ;;  %2092 = vmatprep.mubr.msk.bf16.mxu1 %vm506_vm2, %v2156_v23 }
  0x38   : > { %2061 = vmatmul.mubr.msk.bf16.gmra.mrb[16].mxu0 %vm506_vm2, %v2157_v24  ;;  %2093 = vmatmul.mubr.msk.bf16.gmra.mrb[16].mxu1 %vm506_vm2, %v2158_v25 }
  0x39   : > { %2064 = vmatprep.mubr.msk.bf16.mxu0 %vm506_vm2, %v2159_v26  ;;  %2096 = vmatprep.mubr.msk.bf16.mxu1 %vm506_vm2, %v2160_v27 }
  0x40   : > { %2065 = vmatmul.mubr.msk.bf16.gmra.mrb[20].mxu0 %vm506_vm2, %v2161_v28  ;;  %2097 = vmatmul.mubr.msk.bf16.gmra.mrb[20].mxu1 %vm506_vm2, %v2162_v29 }
  0x41   : > { %2068 = vmatprep.mubr.msk.bf16.mxu0 %vm506_vm2, %v2163_v30  ;;  %2100 = vmatprep.mubr.msk.bf16.mxu1 %vm506_vm2, %v2164_v31 }
  0x48   : > { %2069 = vmatmul.mubr.msk.bf16.gmra.mrb[24].mxu0 %vm506_vm2, %v2165_v32  ;;  %2101 = vmatmul.mubr.msk.bf16.gmra.mrb[24].mxu1 %vm506_vm2, %v2166_v33 }
  0x49   : > { %2072 = vmatprep.mubr.msk.bf16.mxu0 %vm506_vm2, %v2167_v34  ;;  %2104 = vmatprep.mubr.msk.bf16.mxu1 %vm506_vm2, %v2168_v35 }
  0x50   : > { %2073 = vmatmul.mubr.msk.bf16.gmra.mrb[28].mxu0 %vm506_vm2, %v2169_v36  ;;  %2105 = vmatmul.mubr.msk.bf16.gmra.mrb[28].mxu1 %vm506_vm2, %v2170_v37 }
  0xeb   : > { %v2046_v39 = vpop.f32.mrb[0].mxu0  ;;  %v2078_v42 = vpop.f32.mrb[0].mxu1 }
  0xec   : > { %v908_v41 = vmul.f32 %v2046_v39, %v2452_v38  ;;  %v644_v43 = vpop.f32.mrb[1].mxu0  ;;  %v940_v44 = vmul.f32 %v2078_v42, %v2452_v38  ;;  %v772_v46 = vpop.f32.mrb[1].mxu1 }
  0xed   : > { %v906_v45 = vmul.f32 %v2452_v38, %v644_v43  ;;  %v2047_v47 = vpop.f32.mrb[2].mxu0  ;;  %v938_v49 = vmul.f32 %v2452_v38, %v772_v46  ;;  %v2079_v51 = vpop.f32.mrb[2].mxu1 }
  0xee   : > { %v2463_v48 = vadd.f32 %v2457_v40, %v908_v41  ;;  %v909_v50 = vmul.f32 %v2047_v47, %v2452_v38  ;;  %v647_v52 = vpop.f32.mrb[3].mxu0  ;;  %v2468_v53 = vadd.f32 %v2457_v40, %v940_v44  ;;  %v941_v55 = vmul.f32 %v2079_v51, %v2452_v38  ;;  %v775_v57 = vpop.f32.mrb[3].mxu1 }
  0xef   : > { %v2471_v54 = vadd.f32 %v2457_v40, %v906_v45  ;;  %v907_v56 = vmul.f32 %v2452_v38, %v647_v52  ;;  %v2477_v59 = vadd.f32 %v2457_v40, %v938_v49  ;;  %v939_v61 = vmul.f32 %v2452_v38, %v775_v57 }
  0xf0   : > { %v1043_v58 = vmul.f32 0.5, %v2463_v48  ;;  %v2480_v60 = vadd.f32 %v2457_v40, %v909_v50  ;;  %v1075_v62 = vmul.f32 0.5, %v2468_v53  ;;  %v2486_v0 = vadd.f32 %v2457_v40, %v941_v55 }
  0xf1   : > { %v1041_v63 = vmul.f32 0.5, %v2471_v54  ;;  %v2489_v1 = vadd.f32 %v2457_v40, %v907_v56  ;;  %v1073_v2 = vmul.f32 0.5, %v2477_v59  ;;  %v2494_v4 = vadd.f32 %v2457_v40, %v939_v61 }
  0xf2   : > { %2171 = vtanh.f32 %v1043_v58  ;;  %v1044_v3 = vmul.f32 0.5, %v2480_v60  ;;  %v1076_v5 = vmul.f32 0.5, %v2486_v0 }
  0xf3   : > { %2173 = vtanh.f32 %v1075_v62  ;;  %v2050_v6 = vpop.f32.mrb[4].mxu0  ;;  %v1042_v7 = vmul.f32 0.5, %v2489_v1  ;;  %v2082_v9 = vpop.f32.mrb[4].mxu1  ;;  %v1074_v11 = vmul.f32 0.5, %v2494_v4 }
  0xf4   : > { %2175 = vtanh.f32 %v1041_v63  ;;  %v912_v8 = vmul.f32 %v2050_v6, %v2452_v38  ;;  %v660_v10 = vpop.f32.mrb[5].mxu0  ;;  %v944_v12 = vmul.f32 %v2082_v9, %v2452_v38  ;;  %v788_v14 = vpop.f32.mrb[5].mxu1 }
  0xf5   : > { %2177 = vtanh.f32 %v1073_v2  ;;  %v910_v13 = vmul.f32 %v2452_v38, %v660_v10  ;;  %v2051_v15 = vpop.f32.mrb[6].mxu0  ;;  %v942_v17 = vmul.f32 %v2452_v38, %v788_v14  ;;  %v2083_v19 = vpop.f32.mrb[6].mxu1 }
  0xf6   : > { %2179 = vtanh.f32 %v1044_v3  ;;  %v2503_v16 = vadd.f32 %v2457_v40, %v912_v8  ;;  %v913_v18 = vmul.f32 %v2051_v15, %v2452_v38  ;;  %v663_v20 = vpop.f32.mrb[7].mxu0  ;;  %v2508_v21 = vadd.f32 %v2457_v40, %v944_v12  ;;  %v791_v24 = vpop.f32.mrb[7].mxu1 }
  0xf7   : > { %2181 = vtanh.f32 %v1076_v5  ;;  %v2511_v22 = vadd.f32 %v2457_v40, %v910_v13  ;;  %v945_v23 = vmul.f32 %v2083_v19, %v2452_v38  ;;  %v2516_v26 = vadd.f32 %v2457_v40, %v942_v17 }
  0xf8   : > { %2183 = vtanh.f32 %v1042_v7  ;;  %v1047_v25 = vmul.f32 0.5, %v2503_v16  ;;  %v2519_v27 = vadd.f32 %v2457_v40, %v913_v18  ;;  %v1079_v28 = vmul.f32 0.5, %v2508_v21 }
  0xf9   : > { %2185 = vtanh.f32 %v1074_v11  ;;  %v1045_v29 = vmul.f32 0.5, %v2511_v22  ;;  %v2524_v30 = vadd.f32 %v2457_v40, %v945_v23  ;;  %v1077_v31 = vmul.f32 0.5, %v2516_v26 }
  0xfa   : > { %2187 = vtanh.f32 %v1047_v25  ;;  %v1048_v32 = vmul.f32 0.5, %v2519_v27  ;;  %v911_v33 = vmul.f32 %v2452_v38, %v663_v20  ;;  %v943_v35 = vmul.f32 %v2452_v38, %v791_v24 }
  0xfb   : > { %2189 = vtanh.f32 %v1079_v28  ;;  %v1080_v34 = vmul.f32 0.5, %v2524_v30  ;;  %v2054_v36 = vpop.f32.mrb[8].mxu0  ;;  %v2086_v42 = vpop.f32.mrb[8].mxu1 }
  0xfc   : > { %v2172_v37 = vpop.eup %2171  ;;  %2191 = vtanh.f32 %v1045_v29  ;;  %v2532_v39 = vadd.f32 %v2457_v40, %v911_v33  ;;  %v916_v41 = vmul.f32 %v2054_v36, %v2452_v38  ;;  %v2535_v43 = vpop.f32.mrb[9].mxu0  ;;  %v2538_v46 = vadd.f32 %v2457_v40, %v943_v35 }
  0xfd   : > { %v2174_v44 = vpop.eup %2173  ;;  %v1171_v45 = vadd.f32 1.0, %v2172_v37  ;;  %2193 = vtanh.f32 %v1077_v31  ;;  %v2541_v47 = vmul.f32 %v2086_v42, %v2452_v38  ;;  %v2543_v49 = vpop.f32.mrb[9].mxu1 }
  0xfe   : > { %v2545_v50 = vpop.f32.mrb[10].mxu0  ;;  %v2176_v51 = vpop.eup %2175  ;;  %v1203_v52 = vadd.f32 1.0, %v2174_v44  ;;  %2195 = vtanh.f32 %v1048_v32  ;;  %v1046_v55 = vmul.f32 0.5, %v2532_v39  ;;  %v2549_v56 = vadd.f32 %v2457_v40, %v916_v41 }
  0xff   : > { %v2551_v57 = vpop.f32.mrb[10].mxu1  ;;  %v2553_v58 = vpop.f32.mrb[11].mxu0  ;;  %v1235_v62 = vmul.f32 0.5, %v1171_v45  ;;  %v1169_v63 = vadd.f32 1.0, %v2176_v51  ;;  %2197 = vtanh.f32 %v1080_v34  ;;  %v1078_v2 = vmul.f32 0.5, %v2538_v46 }
 0x100   : > { %v2178_v61 = vpop.eup %2177  ;;  %v2556_v3 = vpop.f32.mrb[11].mxu1  ;;  %v1267_v6 = vmul.f32 0.5, %v1203_v52  ;;  %2199 = vtanh.f32 %v1046_v55  ;;  %v1051_v8 = vmul.f32 0.5, %v2549_v56 }
 0x101   : > { %v2180_v5 = vpop.eup %2179  ;;  %v1201_v7 = vadd.f32 1.0, %v2178_v61  ;;  %v1299_v10 = vmul.f32 %v1235_v62, %v2463_v48  ;;  %v1233_v11 = vmul.f32 0.5, %v1169_v63  ;;  %2201 = vtanh.f32 %v1078_v2 }
 0x102   : > { %v2182_v9 = vpop.eup %2181  ;;  %v1172_v12 = vadd.f32 1.0, %v2180_v5  ;;  %v1331_v14 = vmul.f32 %v1267_v6, %v2468_v53  ;;  %2203 = vtanh.f32 %v1051_v8 }
 0x103   : > { %v2184_v13 = vpop.eup %2183  ;;  %v1265_v15 = vmul.f32 0.5, %v1201_v7  ;;  %v1204_v17 = vadd.f32 1.0, %v2182_v9  ;;  %v1944_v19 = vpack.c.bf16 %v1299_v10, %v1299_v10  ;;  %v1297_v48 = vmul.f32 %v1233_v11, %v2471_v54  ;;  %v2569_v24 = vpop.f32.mrb[12].mxu0 }
 0x104   : > { %v2186_v18 = vpop.eup %2185  ;;  %v1236_v20 = vmul.f32 0.5, %v1172_v12  ;;  %v1170_v23 = vadd.f32 1.0, %v2184_v13  ;;  %v1976_v28 = vpack.c.bf16 %v1331_v14, %v1331_v14  ;;  %v2572_v53 = vpop.f32.mrb[12].mxu1 }
 0x105   : > { %v2188_v25 = vpop.eup %2187  ;;  %v1329_v29 = vmul.f32 %v1265_v15, %v2477_v59  ;;  %v1268_v31 = vmul.f32 0.5, %v1204_v17  ;;  %v1202_v32 = vadd.f32 1.0, %v2186_v18  ;;  %v2574_v33 = vpop.f32.mrb[13].mxu0  ;;  %1620 = vst.msk [vmem:[%s2565_s8 + $0x8] sm:$0xf] %vm1617_vm3, %v1944_v19  ;;  %v1942_v54 = vpack.c.bf16 %v1297_v48, %v1297_v48 }
 0x106   : > { %v2190_v34 = vpop.eup %2189  ;;  %v1300_v35 = vmul.f32 %v1236_v20, %v2480_v60  ;;  %v1234_v36 = vmul.f32 0.5, %v1170_v23  ;;  %v1175_v37 = vadd.f32 1.0, %v2188_v25  ;;  %v2579_v41 = vpop.f32.mrb[13].mxu1  ;;  %1652 = vst.msk [vmem:[%s2565_s8 + $0x88] sm:$0xf] %vm1617_vm3, %v1976_v28 }
 0x107   : > { %v2581_v42 = vpop.f32.mrb[14].mxu0  ;;  %v2192_v59 = vpop.eup %2191  ;;  %v1974_v44 = vpack.c.bf16 %v1329_v29, %v1329_v29  ;;  %v1332_v45 = vmul.f32 %v1268_v31, %v2486_v0  ;;  %v1266_v51 = vmul.f32 0.5, %v1202_v32  ;;  %v1207_v52 = vadd.f32 1.0, %v2190_v34  ;;  %1618 = vst.msk [vmem:[%s2565_s8] sm:$0xf] %vm1617_vm3, %v1942_v54 }
 0x108   : > { %v2586_v55 = vpop.f32.mrb[14].mxu1  ;;  %v2588_v61 = vpop.f32.mrb[15].mxu0  ;;  %v1945_v62 = vpack.c.bf16 %v1300_v35, %v1300_v35  ;;  %v1298_v63 = vmul.f32 %v1234_v36, %v2489_v1  ;;  %v1239_v2 = vmul.f32 0.5, %v1175_v37  ;;  %v1173_v5 = vadd.f32 1.0, %v2192_v59 }
 0x109   : > { %v2194_v60 = vpop.eup %2193  ;;  %v2593_v6 = vpop.f32.mrb[15].mxu1  ;;  %1650 = vst.msk [vmem:[%s2565_s8 + $0x80] sm:$0xf] %vm1617_vm3, %v1974_v44  ;;  %v1977_v0 = vpack.c.bf16 %v1332_v45, %v1332_v45  ;;  %v1330_v8 = vmul.f32 %v1266_v51, %v2494_v4  ;;  %v1271_v9 = vmul.f32 0.5, %v1207_v52 }
 0x10a   : > { %v2196_v7 = vpop.eup %2195  ;;  %v1205_v10 = vadd.f32 1.0, %v2194_v60  ;;  %1621 = vst.msk [vmem:[%s2565_s8 + $0xc] sm:$0xf] %vm1617_vm3, %v1945_v62  ;;  %v1943_v12 = vpack.c.bf16 %v1298_v63, %v1298_v63  ;;  %v1303_v1 = vmul.f32 %v1239_v2, %v2503_v16  ;;  %v1237_v13 = vmul.f32 0.5, %v1173_v5 }
 0x10b   : > { %v2198_v11 = vpop.eup %2197  ;;  %v1176_v14 = vadd.f32 1.0, %v2196_v7  ;;  %1653 = vst.msk [vmem:[%s2565_s8 + $0x8c] sm:$0xf] %vm1617_vm3, %v1977_v0  ;;  %v1975_v17 = vpack.c.bf16 %v1330_v8, %v1330_v8  ;;  %v1335_v18 = vmul.f32 %v1271_v9, %v2508_v21  ;;  %v2607_v28 = vpop.f32.mrb[16].mxu0  ;;  %v2628_v60 = vadd.f32 %v2457_v40, %v2541_v47 }
 0x10c   : > { %v2200_v15 = vpop.eup %2199  ;;  %v1269_v19 = vmul.f32 0.5, %v1205_v10  ;;  %v1208_v4 = vadd.f32 1.0, %v2198_v11  ;;  %1619 = vst.msk [vmem:[%s2565_s8 + $0x4] sm:$0xf] %vm1617_vm3, %v1943_v12  ;;  %v1948_v20 = vpack.c.bf16 %v1303_v1, %v1303_v1  ;;  %v1301_v23 = vmul.f32 %v1237_v13, %v2511_v22  ;;  %v2612_v54 = vpop.f32.mrb[16].mxu1 }
 0x10d   : > { %v2202_v48 = vpop.eup %2201  ;;  %v1240_v25 = vmul.f32 0.5, %v1176_v14  ;;  %v1174_v16 = vadd.f32 1.0, %v2200_v15  ;;  %1651 = vst.msk [vmem:[%s2565_s8 + $0x84] sm:$0xf] %vm1617_vm3, %v1975_v17  ;;  %v1980_v31 = vpack.c.bf16 %v1335_v18, %v1335_v18  ;;  %v2614_v35 = vpop.f32.mrb[17].mxu0  ;;  %v1083_v8 = vmul.f32 0.5, %v2628_v60 }
 0x10e   : > { %v2204_v29 = vpop.eup %2203  ;;  %v1333_v21 = vmul.f32 %v1269_v19, %v2516_v26  ;;  %v1272_v32 = vmul.f32 0.5, %v1208_v4  ;;  %v1206_v34 = vadd.f32 1.0, %v2202_v48  ;;  %1624 = vst.msk [vmem:[%s2565_s8 + $0x18] sm:$0xf] %vm1617_vm3, %v1948_v20  ;;  %v1946_v22 = vpack.c.bf16 %v1301_v23, %v1301_v23  ;;  %v2619_v44 = vpop.f32.mrb[17].mxu1 }
 0x10f   : > { %v1304_v36 = vmul.f32 %v1240_v25, %v2519_v27  ;;  %v1238_v37 = vmul.f32 0.5, %v1174_v16  ;;  %v1179_v59 = vadd.f32 1.0, %v2204_v29  ;;  %v2621_v45 = vpop.f32.mrb[18].mxu0  ;;  %1656 = vst.msk [vmem:[%s2565_s8 + $0x98] sm:$0xf] %vm1617_vm3, %v1980_v31  ;;  %v2630_v62 = vpop.f32.mrb[18].mxu1  ;;  %v946_v9 = vmul.f32 %v2452_v38, %v2543_v49 }
 0x110   : > { %v1978_v26 = vpack.c.bf16 %v1333_v21, %v1333_v21  ;;  %v1336_v51 = vmul.f32 %v1272_v32, %v2524_v30  ;;  %v1270_v52 = vmul.f32 0.5, %v1206_v34  ;;  %v2632_v27 = vpop.f32.mrb[19].mxu0  ;;  %1622 = vst.msk [vmem:[%s2565_s8 + $0x10] sm:$0xf] %vm1617_vm3, %v1946_v22  ;;  %v914_v30 = vmul.f32 %v2452_v38, %v2535_v43  ;;  %v2639_v7 = vpop.f32.mrb[19].mxu1 }
 0x111   : > { %v1949_v63 = vpack.c.bf16 %v1304_v36, %v1304_v36  ;;  %v1302_v2 = vmul.f32 %v1238_v37, %v2532_v39  ;;  %v1243_v5 = vmul.f32 0.5, %v1179_v59  ;;  %v917_v11 = vmul.f32 %v2545_v50, %v2452_v38 }
 0x112   : > { %1654 = vst.msk [vmem:[%s2565_s8 + $0x90] sm:$0xf] %vm1617_vm3, %v1978_v26  ;;  %v1981_v47 = vpack.c.bf16 %v1336_v51, %v1336_v51  ;;  %v1334_v0 = vmul.f32 %v1270_v52, %v2538_v46  ;;  %v2651_v43 = vadd.f32 %v2457_v40, %v914_v30  ;;  %2205 = vtanh.f32 %v1083_v8 }
 0x113   : > { %1625 = vst.msk [vmem:[%s2565_s8 + $0x1c] sm:$0xf] %vm1617_vm3, %v1949_v63  ;;  %v1947_v39 = vpack.c.bf16 %v1302_v2, %v1302_v2  ;;  %v1307_v10 = vmul.f32 %v1243_v5, %v2549_v56  ;;  %v2658_v12 = vadd.f32 %v2457_v40, %v946_v9  ;;  %v949_v49 = vmul.f32 %v2551_v57, %v2452_v38  ;;  %v2670_v14 = vpop.f32.mrb[20].mxu0  ;;  %v2682_v19 = vpop.f32.mrb[20].mxu1 }
 0x114   : > { %1657 = vst.msk [vmem:[%s2565_s8 + $0x9c] sm:$0xf] %vm1617_vm3, %v1981_v47  ;;  %v1979_v46 = vpack.c.bf16 %v1334_v0, %v1334_v0  ;;  %v1049_v1 = vmul.f32 0.5, %v2651_v43  ;;  %v2666_v13 = vadd.f32 %v2457_v40, %v917_v11  ;;  %v915_v50 = vmul.f32 %v2452_v38, %v2553_v58  ;;  %v2684_v4 = vpop.f32.mrb[21].mxu0  ;;  %v2694_v23 = vpop.f32.mrb[21].mxu1 }
 0x115   : > { %1623 = vst.msk [vmem:[%s2565_s8 + $0x14] sm:$0xf] %vm1617_vm3, %v1947_v39  ;;  %v1952_v56 = vpack.c.bf16 %v1307_v10, %v1307_v10  ;;  %v1081_v15 = vmul.f32 0.5, %v2658_v12  ;;  %v2676_v17 = vadd.f32 %v2457_v40, %v949_v49  ;;  %v947_v57 = vmul.f32 %v2452_v38, %v2556_v3  ;;  %v2696_v3 = vpop.f32.mrb[22].mxu0  ;;  %v2705_v29 = vpop.f32.mrb[22].mxu1 }
 0x116   : > { %1655 = vst.msk [vmem:[%s2565_s8 + $0x94] sm:$0xf] %vm1617_vm3, %v1979_v46  ;;  %v920_v18 = vmul.f32 %v2569_v24, %v2452_v38  ;;  %2207 = vtanh.f32 %v1049_v1  ;;  %v1052_v58 = vmul.f32 0.5, %v2666_v13  ;;  %v2690_v48 = vadd.f32 %v2457_v40, %v915_v50  ;;  %v2707_v31 = vpop.f32.mrb[23].mxu0  ;;  %v2715_v34 = vpop.f32.mrb[23].mxu1 }
 0x117   : > { %1628 = vst.msk [vmem:[%s2565_s8 + $0x28] sm:$0xf] %vm1617_vm3, %v1952_v56  ;;  %v952_v20 = vmul.f32 %v2572_v53, %v2452_v38  ;;  %2209 = vtanh.f32 %v1081_v15  ;;  %v1084_v24 = vmul.f32 0.5, %v2676_v17  ;;  %v2700_v25 = vadd.f32 %v2457_v40, %v947_v57 }
 0x118   : > { %v2703_v16 = vadd.f32 %v2457_v40, %v920_v18  ;;  %2211 = vtanh.f32 %v1052_v58  ;;  %v1050_v53 = vmul.f32 0.5, %v2690_v48  ;;  %v918_v32 = vmul.f32 %v2452_v38, %v2574_v33 }
 0x119   : > { %v2711_v21 = vadd.f32 %v2457_v40, %v952_v20  ;;  %2213 = vtanh.f32 %v1084_v24  ;;  %v1082_v22 = vmul.f32 0.5, %v2700_v25  ;;  %v950_v37 = vmul.f32 %v2452_v38, %v2579_v41 }
 0x11a   : > { %v1055_v36 = vmul.f32 0.5, %v2703_v16  ;;  %2215 = vtanh.f32 %v1050_v53  ;;  %v2723_v26 = vadd.f32 %v2457_v40, %v918_v32  ;;  %v921_v51 = vmul.f32 %v2581_v42, %v2452_v38 }
 0x11b   : > { %v1087_v59 = vmul.f32 0.5, %v2711_v21  ;;  %2217 = vtanh.f32 %v1082_v22  ;;  %v2728_v33 = vadd.f32 %v2457_v40, %v950_v37  ;;  %v953_v52 = vmul.f32 %v2586_v55, %v2452_v38  ;;  %v2740_v42 = vpop.f32.mrb[24].mxu0  ;;  %v2749_v0 = vpop.f32.mrb[24].mxu1 }
 0x11c   : > { %v919_v63 = vmul.f32 %v2452_v38, %v2588_v61  ;;  %2219 = vtanh.f32 %v1055_v36  ;;  %v1053_v41 = vmul.f32 0.5, %v2723_v26  ;;  %v2736_v2 = vadd.f32 %v2457_v40, %v921_v51  ;;  %v2206_v30 = vpop.eup %2205  ;;  %v2751_v8 = vpop.f32.mrb[25].mxu0 }
 0x11d   : > { %v951_v5 = vmul.f32 %v2452_v38, %v2593_v6  ;;  %2221 = vtanh.f32 %v1087_v59  ;;  %v1085_v47 = vmul.f32 0.5, %v2728_v33  ;;  %v2744_v55 = vadd.f32 %v2457_v40, %v953_v52  ;;  %v2757_v10 = vpop.f32.mrb[25].mxu1  ;;  %v2759_v11 = vpop.f32.mrb[26].mxu0 }
 0x11e   : > { %v2747_v61 = vadd.f32 %v2457_v40, %v919_v63  ;;  %v1211_v9 = vadd.f32 1.0, %v2206_v30  ;;  %2223 = vtanh.f32 %v1053_v41  ;;  %v1056_v6 = vmul.f32 0.5, %v2736_v2  ;;  %v2765_v1 = vpop.f32.mrb[26].mxu1  ;;  %v2767_v50 = vpop.f32.mrb[27].mxu0 }
 0x11f   : > { %v2755_v39 = vadd.f32 %v2457_v40, %v951_v5  ;;  %2225 = vtanh.f32 %v1085_v47  ;;  %v1088_v46 = vmul.f32 0.5, %v2744_v55  ;;  %v924_v56 = vmul.f32 %v2607_v28, %v2452_v38  ;;  %v2772_v20 = vpop.f32.mrb[27].mxu1 }
 0x120   : > { %v1054_v49 = vmul.f32 0.5, %v2747_v61  ;;  %v2208_v15 = vpop.eup %2207  ;;  %v1275_v57 = vmul.f32 0.5, %v1211_v9  ;;  %2227 = vtanh.f32 %v1056_v6  ;;  %v956_v58 = vmul.f32 %v2612_v54, %v2452_v38 }
 0x121   : > { %v1086_v18 = vmul.f32 0.5, %v2755_v39  ;;  %v2210_v24 = vpop.eup %2209  ;;  %v1177_v53 = vadd.f32 1.0, %v2208_v15  ;;  %2229 = vtanh.f32 %v1088_v46  ;;  %v2775_v32 = vadd.f32 %v2457_v40, %v924_v56 }
 0x122   : > { %v2779_v28 = vmul.f32 %v2452_v38, %v2614_v35  ;;  %v2212_v22 = vpop.eup %2211  ;;  %v1339_v36 = vmul.f32 %v1275_v57, %v2628_v60  ;;  %v1209_v37 = vadd.f32 1.0, %v2210_v24  ;;  %2231 = vtanh.f32 %v1054_v49 }
 0x123   : > { %v2783_v59 = vadd.f32 %v2457_v40, %v956_v58  ;;  %v2214_v54 = vpop.eup %2213  ;;  %v1241_v51 = vmul.f32 0.5, %v1177_v53  ;;  %v1180_v52 = vadd.f32 1.0, %v2212_v22  ;;  %2233 = vtanh.f32 %v1086_v18  ;;  %v2787_v9 = vpop.f32.mrb[28].mxu0 }
 0x124   : > { %v1059_v63 = vmul.f32 0.5, %v2775_v32  ;;  %v2216_v41 = vpop.eup %2215  ;;  %v1984_v5 = vpack.c.bf16 %v1339_v36, %v1339_v36  ;;  %v1273_v30 = vmul.f32 0.5, %v1209_v37  ;;  %v1212_v35 = vadd.f32 1.0, %v2214_v54  ;;  %v2790_v56 = vpop.f32.mrb[28].mxu1 }
 0x125   : > { %v1091_v47 = vmul.f32 0.5, %v2783_v59  ;;  %v2218_v60 = vpop.eup %2217  ;;  %v1305_v6 = vmul.f32 %v1241_v51, %v2651_v43  ;;  %v1244_v46 = vmul.f32 0.5, %v1180_v52  ;;  %v1178_v49 = vadd.f32 1.0, %v2216_v41  ;;  %v2792_v15 = vpop.f32.mrb[29].mxu0 }
 0x126   : > { %2235 = vtanh.f32 %v1059_v63  ;;  %v2220_v57 = vpop.eup %2219  ;;  %1660 = vst.msk [vmem:[%s2565_s8 + $0xa8] sm:$0xf] %vm1617_vm3, %v1984_v5  ;;  %v1337_v18 = vmul.f32 %v1273_v30, %v2658_v12  ;;  %v1276_v58 = vmul.f32 0.5, %v1212_v35  ;;  %v1210_v24 = vadd.f32 1.0, %v2218_v60  ;;  %v2797_v53 = vpop.f32.mrb[29].mxu1 }
 0x127   : > { %2237 = vtanh.f32 %v1091_v47  ;;  %v2799_v22 = vpop.f32.mrb[30].mxu0  ;;  %v2222_v43 = vpop.eup %2221  ;;  %v1950_v36 = vpack.c.bf16 %v1305_v6, %v1305_v6  ;;  %v1308_v37 = vmul.f32 %v1244_v46, %v2666_v13  ;;  %v1242_v54 = vmul.f32 0.5, %v1178_v49 }
 0x128   : > { %v1183_v51 = vadd.f32 1.0, %v2220_v57  ;;  %v2802_v52 = vpop.f32.mrb[30].mxu1  ;;  %v2804_v63 = vpop.f32.mrb[31].mxu0  ;;  %v1982_v41 = vpack.c.bf16 %v1337_v18, %v1337_v18  ;;  %v1340_v5 = vmul.f32 %v1276_v58, %v2676_v17  ;;  %v1274_v30 = vmul.f32 0.5, %v1210_v24 }
 0x129   : > { %v2224_v12 = vpop.eup %2223  ;;  %v1215_v35 = vadd.f32 1.0, %v2222_v43  ;;  %v2807_v47 = vpop.f32.mrb[31].mxu1  ;;  %1626 = vst.msk [vmem:[%s2565_s8 + $0x20] sm:$0xf] %vm1617_vm3, %v1950_v36  ;;  %v1953_v13 = vpack.c.bf16 %v1308_v37, %v1308_v37  ;;  %v1306_v6 = vmul.f32 %v1242_v54, %v2690_v48 }
 0x12a   : > { %3135 = vst [vmem:[#allocation2_spill] sm:$0xff] %v2807_v47  ;;  %v2226_v60 = vpop.eup %2225  ;;  %v1247_v46 = vmul.f32 0.5, %v1183_v51  ;;  %v1181_v49 = vadd.f32 1.0, %v2224_v12  ;;  %1658 = vst.msk [vmem:[%s2565_s8 + $0xa0] sm:$0xf] %vm1617_vm3, %v1982_v41  ;;  %v1985_v18 = vpack.c.bf16 %v1340_v5, %v1340_v5  ;;  %v1338_v17 = vmul.f32 %v1274_v30, %v2700_v25 }
 0x12b   : > { %v2228_v57 = vpop.eup %2227  ;;  %v1279_v58 = vmul.f32 0.5, %v1215_v35  ;;  %v1213_v24 = vadd.f32 1.0, %v2226_v60  ;;  %1629 = vst.msk [vmem:[%s2565_s8 + $0x2c] sm:$0xf] %vm1617_vm3, %v1953_v13  ;;  %v1951_v47 = vpack.c.bf16 %v1306_v6, %v1306_v6 }
 0x12c   : > { %v2230_v43 = vpop.eup %2229  ;;  %v1311_v36 = vmul.f32 %v1247_v46, %v2703_v16  ;;  %v1245_v48 = vmul.f32 0.5, %v1181_v49  ;;  %v1184_v37 = vadd.f32 1.0, %v2228_v57  ;;  %1661 = vst.msk [vmem:[%s2565_s8 + $0xac] sm:$0xf] %vm1617_vm3, %v1985_v18  ;;  %v1983_v51 = vpack.c.bf16 %v1338_v17, %v1338_v17 }
 0x12d   : > { %v2232_v54 = vpop.eup %2231  ;;  %v1343_v12 = vmul.f32 %v1279_v58, %v2711_v21  ;;  %v1277_v25 = vmul.f32 0.5, %v1213_v24  ;;  %v1216_v41 = vadd.f32 1.0, %v2230_v43  ;;  %1627 = vst.msk [vmem:[%s2565_s8 + $0x24] sm:$0xf] %vm1617_vm3, %v1951_v47 }
 0x12e   : > { %v2234_v5 = vpop.eup %2233  ;;  %v1956_v30 = vpack.c.bf16 %v1311_v36, %v1311_v36  ;;  %v1309_v35 = vmul.f32 %v1245_v48, %v2723_v26  ;;  %v1248_v60 = vmul.f32 0.5, %v1184_v37  ;;  %v1182_v16 = vadd.f32 1.0, %v2232_v54  ;;  %1659 = vst.msk [vmem:[%s2565_s8 + $0xa4] sm:$0xf] %vm1617_vm3, %v1983_v51 }
 0x12f   : > { %v1988_v13 = vpack.c.bf16 %v1343_v12, %v1343_v12  ;;  %v1341_v6 = vmul.f32 %v1277_v25, %v2728_v33  ;;  %v1280_v46 = vmul.f32 0.5, %v1216_v41  ;;  %v1214_v49 = vadd.f32 1.0, %v2234_v5 }
 0x130   : > { %v2236_v21 = vpop.eup %2235  ;;  %1632 = vst.msk [vmem:[%s2565_s8 + $0x38] sm:$0xf] %vm1617_vm3, %v1956_v30  ;;  %v1954_v57 = vpack.c.bf16 %v1309_v35, %v1309_v35  ;;  %v1312_v47 = vmul.f32 %v1248_v60, %v2736_v2  ;;  %v1246_v18 = vmul.f32 0.5, %v1182_v16  ;;  %v2832_v26 = vadd.f32 %v2457_v40, %v2779_v28 }
 0x131   : > { %v2238_v17 = vpop.eup %2237  ;;  %1664 = vst.msk [vmem:[%s2565_s8 + $0xb8] sm:$0xf] %vm1617_vm3, %v1988_v13  ;;  %v1986_v58 = vpack.c.bf16 %v1341_v6, %v1341_v6  ;;  %v1344_v33 = vmul.f32 %v1280_v46, %v2744_v55  ;;  %v1278_v24 = vmul.f32 0.5, %v1214_v49  ;;  %v1187_v43 = vadd.f32 1.0, %v2236_v21 }
 0x132   : > { %1630 = vst.msk [vmem:[%s2565_s8 + $0x30] sm:$0xf] %vm1617_vm3, %v1954_v57  ;;  %v1957_v36 = vpack.c.bf16 %v1312_v47, %v1312_v47  ;;  %v1310_v2 = vmul.f32 %v1246_v18, %v2747_v61  ;;  %v1219_v48 = vadd.f32 1.0, %v2238_v17  ;;  %v1057_v37 = vmul.f32 0.5, %v2832_v26 }
 0x133   : > { %1662 = vst.msk [vmem:[%s2565_s8 + $0xb0] sm:$0xf] %vm1617_vm3, %v1986_v58  ;;  %v1989_v28 = vpack.c.bf16 %v1344_v33, %v1344_v33  ;;  %v1342_v54 = vmul.f32 %v1278_v24, %v2755_v39  ;;  %v1251_v51 = vmul.f32 0.5, %v1187_v43  ;;  %v954_v55 = vmul.f32 %v2452_v38, %v2619_v44 }
 0x134   : > { %1633 = vst.msk [vmem:[%s2565_s8 + $0x3c] sm:$0xf] %vm1617_vm3, %v1957_v36  ;;  %v1955_v12 = vpack.c.bf16 %v1310_v2, %v1310_v2  ;;  %v1283_v25 = vmul.f32 0.5, %v1219_v48  ;;  %2239 = vtanh.f32 %v1057_v37  ;;  %v925_v61 = vmul.f32 %v2621_v45, %v2452_v38 }
 0x135   : > { %1665 = vst.msk [vmem:[%s2565_s8 + $0xbc] sm:$0xf] %vm1617_vm3, %v1989_v28  ;;  %v1987_v41 = vpack.c.bf16 %v1342_v54, %v1342_v54  ;;  %v1315_v5 = vmul.f32 %v1251_v51, %v2775_v32  ;;  %v2854_v39 = vadd.f32 %v2457_v40, %v954_v55  ;;  %v957_v44 = vmul.f32 %v2630_v62, %v2452_v38 }
 0x136   : > { %1631 = vst.msk [vmem:[%s2565_s8 + $0x34] sm:$0xf] %vm1617_vm3, %v1955_v12  ;;  %v1347_v30 = vmul.f32 %v1283_v25, %v2783_v59  ;;  %v2862_v35 = vadd.f32 %v2457_v40, %v925_v61  ;;  %v923_v45 = vmul.f32 %v2452_v38, %v2632_v27  ;;  %v955_v32 = vmul.f32 %v2452_v38, %v2639_v7 }
 0x137   : > { %1663 = vst.msk [vmem:[%s2565_s8 + $0xb4] sm:$0xf] %vm1617_vm3, %v1987_v41  ;;  %v1960_v60 = vpack.c.bf16 %v1315_v5, %v1315_v5  ;;  %v1089_v16 = vmul.f32 0.5, %v2854_v39  ;;  %v2872_v62 = vadd.f32 %v2457_v40, %v957_v44  ;;  %v928_v59 = vmul.f32 %v2670_v14, %v2452_v38 }
 0x138   : > { %v1992_v13 = vpack.c.bf16 %v1347_v30, %v1347_v30  ;;  %v1060_v6 = vmul.f32 0.5, %v2862_v35  ;;  %v2878_v27 = vadd.f32 %v2457_v40, %v923_v45  ;;  %v2881_v46 = vadd.f32 %v2457_v40, %v955_v32 }
 0x139   : > { %1636 = vst.msk [vmem:[%s2565_s8 + $0x48] sm:$0xf] %vm1617_vm3, %v1960_v60  ;;  %2241 = vtanh.f32 %v1089_v16  ;;  %v1092_v7 = vmul.f32 0.5, %v2872_v62  ;;  %v2887_v49 = vadd.f32 %v2457_v40, %v928_v59  ;;  %v960_v14 = vmul.f32 %v2682_v19, %v2452_v38 }
 0x13a   : > { %1668 = vst.msk [vmem:[%s2565_s8 + $0xc8] sm:$0xf] %vm1617_vm3, %v1992_v13  ;;  %2243 = vtanh.f32 %v1060_v6  ;;  %v1058_v21 = vmul.f32 0.5, %v2878_v27  ;;  %v1090_v57 = vmul.f32 0.5, %v2881_v46  ;;  %v926_v47 = vmul.f32 %v2452_v38, %v2684_v4 }
 0x13b   : > { %2245 = vtanh.f32 %v1092_v7  ;;  %v1063_v18 = vmul.f32 0.5, %v2887_v49  ;;  %v2899_v17 = vadd.f32 %v2457_v40, %v960_v14  ;;  %v958_v58 = vmul.f32 %v2452_v38, %v2694_v23 }
 0x13c   : > { %2247 = vtanh.f32 %v1058_v21  ;;  %v2904_v19 = vadd.f32 %v2457_v40, %v926_v47  ;;  %v929_v33 = vmul.f32 %v2696_v3, %v2452_v38  ;;  %v961_v24 = vmul.f32 %v2705_v29, %v2452_v38 }
 0x13d   : > { %2249 = vtanh.f32 %v1090_v57  ;;  %v1095_v4 = vmul.f32 0.5, %v2899_v17  ;;  %v2912_v43 = vadd.f32 %v2457_v40, %v958_v58  ;;  %v927_v36 = vmul.f32 %v2452_v38, %v2707_v31 }
 0x13e   : > { %v2240_v23 = vpop.eup %2239  ;;  %2251 = vtanh.f32 %v1063_v18  ;;  %v1061_v2 = vmul.f32 0.5, %v2904_v19  ;;  %v2918_v48 = vadd.f32 %v2457_v40, %v929_v33  ;;  %v2921_v3 = vadd.f32 %v2457_v40, %v961_v24 }
 0x13f   : > { %v1185_v29 = vadd.f32 1.0, %v2240_v23  ;;  %2253 = vtanh.f32 %v1095_v4  ;;  %v1093_v37 = vmul.f32 0.5, %v2912_v43  ;;  %v2925_v28 = vadd.f32 %v2457_v40, %v927_v36 }
 0x140   : > { %2255 = vtanh.f32 %v1061_v2  ;;  %v1064_v31 = vmul.f32 0.5, %v2918_v48  ;;  %v1096_v54 = vmul.f32 0.5, %v2921_v3  ;;  %v959_v51 = vmul.f32 %v2452_v38, %v2715_v34 }
 0x141   : > { %v1249_v55 = vmul.f32 0.5, %v1185_v29  ;;  %2257 = vtanh.f32 %v1093_v37  ;;  %v1062_v12 = vmul.f32 0.5, %v2925_v28  ;;  %v932_v25 = vmul.f32 %v2740_v42, %v2452_v38 }
 0x142   : > { %2259 = vtanh.f32 %v1064_v31  ;;  %v2935_v61 = vadd.f32 %v2457_v40, %v959_v51  ;;  %v964_v41 = vmul.f32 %v2749_v0, %v2452_v38  ;;  %v930_v5 = vmul.f32 %v2452_v38, %v2751_v8 }
 0x143   : > { %v2242_v44 = vpop.eup %2241  ;;  %v1313_v34 = vmul.f32 %v1249_v55, %v2832_v26  ;;  %2261 = vtanh.f32 %v1096_v54  ;;  %v2943_v30 = vadd.f32 %v2457_v40, %v932_v25  ;;  %v2947_v42 = vmul.f32 %v2452_v38, %v2757_v10 }
 0x144   : > { %v2244_v45 = vpop.eup %2243  ;;  %v1217_v32 = vadd.f32 1.0, %v2242_v44  ;;  %2263 = vtanh.f32 %v1062_v12  ;;  %v1094_v0 = vmul.f32 0.5, %v2935_v61  ;;  %v2951_v60 = vadd.f32 %v2457_v40, %v964_v41 }
 0x145   : > { %v2246_v8 = vpop.eup %2245  ;;  %v1958_v16 = vpack.c.bf16 %v1313_v34, %v1313_v34  ;;  %v1188_v26 = vadd.f32 1.0, %v2244_v45  ;;  %v1067_v59 = vmul.f32 0.5, %v2943_v30  ;;  %v2955_v13 = vadd.f32 %v2457_v40, %v930_v5 }
 0x146   : > { %v2248_v6 = vpop.eup %2247  ;;  %v1281_v38 = vmul.f32 0.5, %v1217_v32  ;;  %v1220_v10 = vadd.f32 1.0, %v2246_v8  ;;  %2265 = vtanh.f32 %v1094_v0  ;;  %v1099_v7 = vmul.f32 0.5, %v2951_v60 }
 0x147   : > { %v2250_v14 = vpop.eup %2249  ;;  %1634 = vst.msk [vmem:[%s2565_s8 + $0x40] sm:$0xf] %vm1617_vm3, %v1958_v16  ;;  %v1252_v21 = vmul.f32 0.5, %v1188_v26  ;;  %v1186_v57 = vadd.f32 1.0, %v2248_v6  ;;  %2267 = vtanh.f32 %v1067_v59  ;;  %v1065_v47 = vmul.f32 0.5, %v2955_v13 }
 0x148   : > { %v2252_v18 = vpop.eup %2251  ;;  %v1345_v58 = vmul.f32 %v1281_v38, %v2854_v39  ;;  %v1284_v33 = vmul.f32 0.5, %v1220_v10  ;;  %v1218_v40 = vadd.f32 1.0, %v2250_v14  ;;  %2269 = vtanh.f32 %v1099_v7 }
 0x149   : > { %v2254_v24 = vpop.eup %2253  ;;  %v1316_v4 = vmul.f32 %v1252_v21, %v2862_v35  ;;  %v1250_v36 = vmul.f32 0.5, %v1186_v57  ;;  %v1191_v23 = vadd.f32 1.0, %v2252_v18  ;;  %2271 = vtanh.f32 %v1065_v47 }
 0x14a   : > { %v2256_v2 = vpop.eup %2255  ;;  %v1990_v29 = vpack.c.bf16 %v1345_v58, %v1345_v58  ;;  %v1348_v37 = vmul.f32 %v1284_v33, %v2872_v62  ;;  %v1282_v31 = vmul.f32 0.5, %v1218_v40  ;;  %v1223_v54 = vadd.f32 1.0, %v2254_v24 }
 0x14b   : > { %v2258_v51 = vpop.eup %2257  ;;  %v1961_v55 = vpack.c.bf16 %v1316_v4, %v1316_v4  ;;  %v1314_v39 = vmul.f32 %v1250_v36, %v2878_v27  ;;  %v1255_v12 = vmul.f32 0.5, %v1191_v23  ;;  %v1189_v25 = vadd.f32 1.0, %v2256_v2 }
 0x14c   : > { %v2260_v41 = vpop.eup %2259  ;;  %1666 = vst.msk [vmem:[%s2565_s8 + $0xc0] sm:$0xf] %vm1617_vm3, %v1990_v29  ;;  %v1993_v35 = vpack.c.bf16 %v1348_v37, %v1348_v37  ;;  %v1346_v5 = vmul.f32 %v1282_v31, %v2881_v46  ;;  %v1287_v44 = vmul.f32 0.5, %v1223_v54  ;;  %v1221_v34 = vadd.f32 1.0, %v2258_v51 }
 0x14d   : > { %v2262_v45 = vpop.eup %2261  ;;  %1637 = vst.msk [vmem:[%s2565_s8 + $0x4c] sm:$0xf] %vm1617_vm3, %v1961_v55  ;;  %v1959_v62 = vpack.c.bf16 %v1314_v39, %v1314_v39  ;;  %v1319_v32 = vmul.f32 %v1255_v12, %v2887_v49  ;;  %v1253_v27 = vmul.f32 0.5, %v1189_v25  ;;  %v1192_v0 = vadd.f32 1.0, %v2260_v41  ;;  %v2300_v12 = vld [vmem:[%s3132_s2] ss:$0 sm:$0xff] }
 0x14e   : > { %v2264_v8 = vpop.eup %2263  ;;  %1669 = vst.msk [vmem:[%s2565_s8 + $0xcc] sm:$0xf] %vm1617_vm3, %v1993_v35  ;;  %v1991_v16 = vpack.c.bf16 %v1346_v5, %v1346_v5  ;;  %v1351_v26 = vmul.f32 %v1287_v44, %v2899_v17  ;;  %v1285_v59 = vmul.f32 0.5, %v1221_v34  ;;  %v1224_v46 = vadd.f32 1.0, %v2262_v45  ;;  %v2983_v17 = vld [vmem:[%s3133_s3] ss:$0 sm:$0xff] }
 0x14f   : > { %1635 = vst.msk [vmem:[%s2565_s8 + $0x44] sm:$0xf] %vm1617_vm3, %v1959_v62  ;;  %v1964_v6 = vpack.c.bf16 %v1319_v32, %v1319_v32  ;;  %v1317_v38 = vmul.f32 %v1253_v27, %v2904_v19  ;;  %v1256_v10 = vmul.f32 0.5, %v1192_v0  ;;  %v1190_v7 = vadd.f32 1.0, %v2264_v8 }
 0x150   : > { %v2266_v49 = vpop.eup %2265  ;;  %1667 = vst.msk [vmem:[%s2565_s8 + $0xc4] sm:$0xf] %vm1617_vm3, %v1991_v16  ;;  %v1996_v14 = vpack.c.bf16 %v1351_v26, %v1351_v26  ;;  %v1349_v21 = vmul.f32 %v1285_v59, %v2912_v43  ;;  %v1288_v57 = vmul.f32 0.5, %v1224_v46  ;;  %v2987_v47 = vadd.f32 %v2983_v17, %v2947_v42 }
 0x151   : > { %v2268_v19 = vpop.eup %2267  ;;  %1640 = vst.msk [vmem:[%s2565_s8 + $0x58] sm:$0xf] %vm1617_vm3, %v1964_v6  ;;  %v1962_v18 = vpack.c.bf16 %v1317_v38, %v1317_v38  ;;  %v1320_v58 = vmul.f32 %v1256_v10, %v2918_v48  ;;  %v1254_v33 = vmul.f32 0.5, %v1190_v7  ;;  %v1222_v43 = vadd.f32 1.0, %v2266_v49 }
 0x152   : > { %v2270_v40 = vpop.eup %2269  ;;  %1672 = vst.msk [vmem:[%s2565_s8 + $0xd8] sm:$0xf] %vm1617_vm3, %v1996_v14  ;;  %v1994_v24 = vpack.c.bf16 %v1349_v21, %v1349_v21  ;;  %v1352_v4 = vmul.f32 %v1288_v57, %v2921_v3  ;;  %v1195_v36 = vadd.f32 1.0, %v2268_v19  ;;  %v1097_v42 = vmul.f32 0.5, %v2987_v47 }
 0x153   : > { %v2272_v23 = vpop.eup %2271  ;;  %1638 = vst.msk [vmem:[%s2565_s8 + $0x50] sm:$0xf] %vm1617_vm3, %v1962_v18  ;;  %v1965_v2 = vpack.c.bf16 %v1320_v58, %v1320_v58  ;;  %v1318_v29 = vmul.f32 %v1254_v33, %v2925_v28  ;;  %v1286_v48 = vmul.f32 0.5, %v1222_v43  ;;  %v1227_v37 = vadd.f32 1.0, %v2270_v40  ;;  %v3136_v33 = vld [vmem:[#allocation2_spill] sm:$0xff] }
 0x154   : > { %1670 = vst.msk [vmem:[%s2565_s8 + $0xd0] sm:$0xf] %vm1617_vm3, %v1994_v24  ;;  %v1997_v31 = vpack.c.bf16 %v1352_v4, %v1352_v4  ;;  %v1259_v54 = vmul.f32 0.5, %v1195_v36  ;;  %v1193_v51 = vadd.f32 1.0, %v2272_v23  ;;  %2273 = vtanh.f32 %v1097_v42 }
 0x155   : > { %1641 = vst.msk [vmem:[%s2565_s8 + $0x5c] sm:$0xf] %vm1617_vm3, %v1965_v2  ;;  %v1963_v3 = vpack.c.bf16 %v1318_v29, %v1318_v29  ;;  %v1350_v55 = vmul.f32 %v1286_v48, %v2935_v61  ;;  %v1291_v39 = vmul.f32 0.5, %v1227_v37  ;;  %v933_v28 = vmul.f32 %v2300_v12, %v2759_v11 }
 0x156   : > { %1673 = vst.msk [vmem:[%s2565_s8 + $0xdc] sm:$0xf] %vm1617_vm3, %v1997_v31  ;;  %v1323_v25 = vmul.f32 %v1259_v54, %v2943_v30  ;;  %v1257_v41 = vmul.f32 0.5, %v1193_v51  ;;  %v965_v35 = vmul.f32 %v2300_v12, %v2765_v1  ;;  %v931_v5 = vmul.f32 %v2300_v12, %v2767_v50 }
 0x157   : > { %1639 = vst.msk [vmem:[%s2565_s8 + $0x54] sm:$0xf] %vm1617_vm3, %v1963_v3  ;;  %v1995_v61 = vpack.c.bf16 %v1350_v55, %v1350_v55  ;;  %v1355_v44 = vmul.f32 %v1291_v39, %v2951_v60  ;;  %v3017_v34 = vadd.f32 %v2983_v17, %v933_v28  ;;  %v963_v11 = vmul.f32 %v2300_v12, %v2772_v20 }
 0x158   : > { %v1968_v45 = vpack.c.bf16 %v1323_v25, %v1323_v25  ;;  %v1321_v30 = vmul.f32 %v1257_v41, %v2955_v13  ;;  %v3022_v62 = vadd.f32 %v2983_v17, %v965_v35  ;;  %v3025_v1 = vadd.f32 %v2983_v17, %v931_v5 }
 0x159   : > { %1671 = vst.msk [vmem:[%s2565_s8 + $0xd4] sm:$0xf] %vm1617_vm3, %v1995_v61  ;;  %v2000_v50 = vpack.c.bf16 %v1355_v44, %v1355_v44  ;;  %v1068_v60 = vmul.f32 0.5, %v3017_v34  ;;  %v3031_v32 = vadd.f32 %v2983_v17, %v963_v11  ;;  %v936_v20 = vmul.f32 %v2300_v12, %v2787_v9 }
 0x15a   : > { %1644 = vst.msk [vmem:[%s2565_s8 + $0x68] sm:$0xf] %vm1617_vm3, %v1968_v45  ;;  %v1966_v13 = vpack.c.bf16 %v1321_v30, %v1321_v30  ;;  %v1100_v27 = vmul.f32 0.5, %v3022_v62  ;;  %v1066_v0 = vmul.f32 0.5, %v3025_v1  ;;  %v968_v8 = vmul.f32 %v2300_v12, %v2790_v56 }
 0x15b   : > { %1676 = vst.msk [vmem:[%s2565_s8 + $0xe8] sm:$0xf] %vm1617_vm3, %v2000_v50  ;;  %2275 = vtanh.f32 %v1068_v60  ;;  %v1098_v16 = vmul.f32 0.5, %v3031_v32  ;;  %v3043_v26 = vadd.f32 %v2983_v17, %v936_v20  ;;  %v934_v59 = vmul.f32 %v2300_v12, %v2792_v15 }
 0x15c   : > { %1642 = vst.msk [vmem:[%s2565_s8 + $0x60] sm:$0xf] %vm1617_vm3, %v1966_v13  ;;  %2277 = vtanh.f32 %v1100_v27  ;;  %v3049_v9 = vadd.f32 %v2983_v17, %v968_v8  ;;  %v966_v46 = vmul.f32 %v2300_v12, %v2797_v53  ;;  %v937_v56 = vmul.f32 %v2300_v12, %v2799_v22 }
 0x15d   : > { %2279 = vtanh.f32 %v1066_v0  ;;  %v1071_v6 = vmul.f32 0.5, %v3043_v26  ;;  %v3055_v38 = vadd.f32 %v2983_v17, %v934_v59  ;;  %v969_v10 = vmul.f32 %v2300_v12, %v2802_v52 }
 0x15e   : > { %v2274_v7 = vpop.eup %2273  ;;  %2281 = vtanh.f32 %v1098_v16  ;;  %v1103_v15 = vmul.f32 0.5, %v3049_v9  ;;  %v3060_v49 = vadd.f32 %v2983_v17, %v966_v46  ;;  %v3063_v14 = vadd.f32 %v2983_v17, %v937_v56 }
 0x15f   : > { %v1225_v53 = vadd.f32 1.0, %v2274_v7  ;;  %2283 = vtanh.f32 %v1071_v6  ;;  %v1069_v22 = vmul.f32 0.5, %v3055_v38  ;;  %v3067_v21 = vadd.f32 %v2983_v17, %v969_v10 }
 0x160   : > { %2285 = vtanh.f32 %v1103_v15  ;;  %v1101_v52 = vmul.f32 0.5, %v3060_v49  ;;  %v1072_v57 = vmul.f32 0.5, %v3063_v14  ;;  %v935_v19 = vmul.f32 %v2300_v12, %v2804_v63 }
 0x161   : > { %v1289_v18 = vmul.f32 0.5, %v1225_v53  ;;  %2287 = vtanh.f32 %v1069_v22  ;;  %v1104_v58 = vmul.f32 0.5, %v3067_v21  ;;  %v967_v43 = vmul.f32 %v2300_v12, %v3136_v33 }
 0x162   : > { %2289 = vtanh.f32 %v1101_v52  ;;  %v3075_v40 = vadd.f32 %v2983_v17, %v935_v19 }
 0x163   : > { %v1353_v24 = vmul.f32 %v1289_v18, %v2987_v47  ;;  %2291 = vtanh.f32 %v1072_v57  ;;  %v3079_v4 = vadd.f32 %v2983_v17, %v967_v43 }
 0x164   : > { %2293 = vtanh.f32 %v1104_v58  ;;  %v1070_v63 = vmul.f32 0.5, %v3075_v40 }
 0x165   : > { %v2276_v36 = vpop.eup %2275  ;;  %v1998_v42 = vpack.c.bf16 %v1353_v24, %v1353_v24  ;;  %v1102_v23 = vmul.f32 0.5, %v3079_v4 }
 0x166   : > { %v2278_v2 = vpop.eup %2277  ;;  %v1196_v29 = vadd.f32 1.0, %v2276_v36  ;;  %2295 = vtanh.f32 %v1070_v63 }
 0x167   : > { %v2280_v48 = vpop.eup %2279  ;;  %1674 = vst.msk [vmem:[%s2565_s8 + $0xe0] sm:$0xf] %vm1617_vm3, %v1998_v42  ;;  %v1228_v37 = vadd.f32 1.0, %v2278_v2  ;;  %2297 = vtanh.f32 %v1102_v23 }
 0x168   : > { %v2282_v47 = vpop.eup %2281  ;;  %v1260_v31 = vmul.f32 0.5, %v1196_v29  ;;  %v1194_v54 = vadd.f32 1.0, %v2280_v48 }
 0x169   : > { %v2284_v17 = vpop.eup %2283  ;;  %v1292_v51 = vmul.f32 0.5, %v1228_v37  ;;  %v1226_v3 = vadd.f32 1.0, %v2282_v47 }
 0x16a   : > { %v2286_v55 = vpop.eup %2285  ;;  %v1324_v39 = vmul.f32 %v1260_v31, %v3017_v34  ;;  %v1258_v12 = vmul.f32 0.5, %v1194_v54  ;;  %v1199_v28 = vadd.f32 1.0, %v2284_v17 }
 0x16b   : > { %v2288_v25 = vpop.eup %2287  ;;  %v1356_v41 = vmul.f32 %v1292_v51, %v3022_v62  ;;  %v1290_v35 = vmul.f32 0.5, %v1226_v3  ;;  %v1231_v5 = vadd.f32 1.0, %v2286_v55 }
 0x16c   : > { %v2290_v61 = vpop.eup %2289  ;;  %v1969_v44 = vpack.c.bf16 %v1324_v39, %v1324_v39  ;;  %v1322_v11 = vmul.f32 %v1258_v12, %v3025_v1  ;;  %v1263_v45 = vmul.f32 0.5, %v1199_v28  ;;  %v1197_v30 = vadd.f32 1.0, %v2288_v25 }
 0x16d   : > { %v2292_v50 = vpop.eup %2291  ;;  %v2001_v60 = vpack.c.bf16 %v1356_v41, %v1356_v41  ;;  %v1354_v34 = vmul.f32 %v1290_v35, %v3031_v32  ;;  %v1295_v20 = vmul.f32 0.5, %v1231_v5  ;;  %v1229_v13 = vadd.f32 1.0, %v2290_v61 }
 0x16e   : > { %v2294_v27 = vpop.eup %2293  ;;  %1645 = vst.msk [vmem:[%s2565_s8 + $0x6c] sm:$0xf] %vm1617_vm3, %v1969_v44  ;;  %v1967_v62 = vpack.c.bf16 %v1322_v11, %v1322_v11  ;;  %v1327_v0 = vmul.f32 %v1263_v45, %v3043_v26  ;;  %v1261_v8 = vmul.f32 0.5, %v1197_v30  ;;  %v1200_v16 = vadd.f32 1.0, %v2292_v50 }
 0x16f   : > { %1677 = vst.msk [vmem:[%s2565_s8 + $0xec] sm:$0xf] %vm1617_vm3, %v2001_v60  ;;  %v1999_v1 = vpack.c.bf16 %v1354_v34, %v1354_v34  ;;  %v1359_v59 = vmul.f32 %v1295_v20, %v3049_v9  ;;  %v1293_v46 = vmul.f32 0.5, %v1229_v13  ;;  %v1232_v56 = vadd.f32 1.0, %v2294_v27 }
 0x170   : > { %v2296_v32 = vpop.eup %2295  ;;  %1643 = vst.msk [vmem:[%s2565_s8 + $0x64] sm:$0xf] %vm1617_vm3, %v1967_v62  ;;  %v1972_v6 = vpack.c.bf16 %v1327_v0, %v1327_v0  ;;  %v1325_v10 = vmul.f32 %v1261_v8, %v3055_v38  ;;  %v1264_v7 = vmul.f32 0.5, %v1200_v16 }
 0x171   : > { %v2298_v26 = vpop.eup %2297  ;;  %1675 = vst.msk [vmem:[%s2565_s8 + $0xe4] sm:$0xf] %vm1617_vm3, %v1999_v1  ;;  %v2004_v15 = vpack.c.bf16 %v1359_v59, %v1359_v59  ;;  %v1357_v53 = vmul.f32 %v1293_v46, %v3060_v49  ;;  %v1296_v22 = vmul.f32 0.5, %v1232_v56  ;;  %v1198_v9 = vadd.f32 1.0, %v2296_v32 }
 0x172   : > { %1648 = vst.msk [vmem:[%s2565_s8 + $0x78] sm:$0xf] %vm1617_vm3, %v1972_v6  ;;  %v1970_v52 = vpack.c.bf16 %v1325_v10, %v1325_v10  ;;  %v1328_v57 = vmul.f32 %v1264_v7, %v3063_v14  ;;  %v1230_v19 = vadd.f32 1.0, %v2298_v26 }
 0x173   : > { %1680 = vst.msk [vmem:[%s2565_s8 + $0xf8] sm:$0xf] %vm1617_vm3, %v2004_v15  ;;  %v2002_v38 = vpack.c.bf16 %v1357_v53, %v1357_v53  ;;  %v1360_v18 = vmul.f32 %v1296_v22, %v3067_v21  ;;  %v1262_v58 = vmul.f32 0.5, %v1198_v9 }
 0x174   : > { %1646 = vst.msk [vmem:[%s2565_s8 + $0x70] sm:$0xf] %vm1617_vm3, %v1970_v52  ;;  %v1973_v49 = vpack.c.bf16 %v1328_v57, %v1328_v57  ;;  %v1294_v33 = vmul.f32 0.5, %v1230_v19 }
 0x175   : > { %1678 = vst.msk [vmem:[%s2565_s8 + $0xf0] sm:$0xf] %vm1617_vm3, %v2002_v38  ;;  %v2005_v43 = vpack.c.bf16 %v1360_v18, %v1360_v18  ;;  %v1326_v24 = vmul.f32 %v1262_v58, %v3075_v40 }
 0x176   : > { %1649 = vst.msk [vmem:[%s2565_s8 + $0x7c] sm:$0xf] %vm1617_vm3, %v1973_v49  ;;  %v1358_v14 = vmul.f32 %v1294_v33, %v3079_v4 }
 0x177   : > { %1681 = vst.msk [vmem:[%s2565_s8 + $0xfc] sm:$0xf] %vm1617_vm3, %v2005_v43  ;;  %v1971_v63 = vpack.c.bf16 %v1326_v24, %v1326_v24 }
 0x178   : > { %v2003_v36 = vpack.c.bf16 %v1358_v14, %v1358_v14 }
 0x179   : > { %1647 = vst.msk [vmem:[%s2565_s8 + $0x74] sm:$0xf] %vm1617_vm3, %v1971_v63 }
 0x17a   : > { %1679 = vst.msk [vmem:[%s2565_s8 + $0xf4] sm:$0xf] %vm1617_vm3, %v2003_v36 }
 0x17b PF: > { %s14_s17 = sadd.s32 1, %s2323_s17   ;;  %s3137_s15 = smov %s2319_s16 }
 0x17c   : > { %p11_p5 = scmp.ge.s32.totalorder %s14_s17, 6   ;;  %s3138_s16 = smov %s3140_s18 }
 0x17e   :  { %13 = sbr.rel (!%p11_p5) target bundleno = 2 (0x2), region = 75 }

</bundles_post_ra>
